<compile_context>
chip_gen: v7x
topology: tpu7x:2x2x1
jax: 0.10.0
libtpu: 0.0.40
codegen_flags: <defaults>
</compile_context>

<pallas_src>
import math

import jax
import jax.numpy as jnp
import numpy as np
from jax.experimental import pallas as pl
from jax.experimental.pallas import tpu as pltpu


def _round_up(x, m):
    return (x + m - 1) // m * m


def _make_nlgc_kernel(*, C, P_pad, C_pad, tq, inv_scale):
    off_v = P_pad            # value rows start (8-aligned)
    off_m = P_pad + C_pad    # mask row (8-aligned)

    def kernel(gamma_ref, xq_ref, xkv_ref, wq_ref, bq_ref, wkvm_ref, bkvm_ref,
               o_ref, q_scr, m_scr, l_scr, acc_scr, gm_scr, gl_scr, gacc_scr):
        ki = pl.program_id(2)
        nk = pl.num_programs(2)

        # ---------- once per (batch, q-tile): query projection + state init ----------
        @pl.when(ki == 0)
        def _init():
            xq = xq_ref[0].astype(jnp.bfloat16)                       # (C, tq)
            # 1x1 conv == matmul; NN on MXU, bf16 in / f32 accumulate.
            q_cm = jax.lax.dot_general(
                wq_ref[...], xq, (((1,), (0,)), ((), ())),
                preferred_element_type=jnp.float32)                   # (P_pad, tq)
            q_cm = (q_cm + bq_ref[...]) * inv_scale                   # fold 1/sqrt(planes)
            # (P_pad, tq) -> (tq, P_pad): exact f32 transpose via identity NT matmul
            # on the MXU (avoids an XLU vector transpose); amortized over all kv steps.
            rows = jax.lax.broadcasted_iota(jnp.int32, (tq, tq), 0)
            cols = jax.lax.broadcasted_iota(jnp.int32, (tq, tq), 1)
            eye_q = (rows == cols).astype(jnp.float32)
            q_nm = jax.lax.dot_general(eye_q, q_cm, (((1,), (1,)), ((), ())),
                                       preferred_element_type=jnp.float32)
            q_scr[...] = q_nm.astype(jnp.bfloat16)
            # online-softmax state (attention + global-context branch)
            m_scr[...] = jnp.full_like(m_scr, -jnp.inf)
            l_scr[...] = jnp.zeros_like(l_scr)
            acc_scr[...] = jnp.zeros_like(acc_scr)
            gm_scr[...] = jnp.full_like(gm_scr, -jnp.inf)
            gl_scr[...] = jnp.zeros_like(gl_scr)
            gacc_scr[...] = jnp.zeros_like(gacc_scr)

        # ---------- every kv step: fused key/value/mask projection (one MXU matmul) ----------
        xkv = xkv_ref[0].astype(jnp.bfloat16)                         # (C, tk)
        kvm = jax.lax.dot_general(
            wkvm_ref[...], xkv, (((1,), (0,)), ((), ())),
            preferred_element_type=jnp.float32) + bkvm_ref[...]       # (P_pad+C_pad+8, tk)
        k_cm = kvm[0:P_pad]                                           # (P_pad, tk)
        v_cm = kvm[off_v:off_v + C_pad]                               # (C_pad, tk)
        m_log = kvm[off_m:off_m + 1]                                  # (1, tk)

        # ---------- non-local attention: online softmax over the kv axis ----------
        sim = jax.lax.dot_general(                                    # (tq, tk), NN on MXU
            q_scr[...], k_cm.astype(jnp.bfloat16), (((1,), (0,)), ((), ())),
            preferred_element_type=jnp.float32)
        m_prev = m_scr[...]
        m_new = jnp.maximum(m_prev, jnp.max(sim, axis=-1, keepdims=True))
        alpha = jnp.exp(m_prev - m_new)
        p = jnp.exp(sim - m_new)                                      # (tq, tk)
        l_scr[...] = alpha * l_scr[...] + jnp.sum(p, axis=-1, keepdims=True)
        acc_scr[...] = alpha * acc_scr[...] + jax.lax.dot_general(    # (tq, C_pad), NT on MXU
            p.astype(jnp.bfloat16), v_cm.astype(jnp.bfloat16),
            (((1,), (1,)), ((), ())), preferred_element_type=jnp.float32)
        m_scr[...] = m_new

        # ---------- global-context branch: online softmax over the full spatial axis ----------
        gm_prev = gm_scr[...]
        gm_new = jnp.maximum(gm_prev, jnp.max(m_log, axis=-1, keepdims=True))
        beta = jnp.exp(gm_prev - gm_new)
        pe = jnp.exp(m_log - gm_new)                                  # (1, tk)
        gl_scr[...] = beta * gl_scr[...] + jnp.sum(pe, axis=-1, keepdims=True)
        gacc_scr[...] = beta * gacc_scr[...] + jnp.sum(v_cm * pe, axis=-1, keepdims=True)
        gm_scr[...] = gm_new

        # ---------- finalize: residual + gamma * attention + global context ----------
        @pl.when(ki == nk - 1)
        def _finalize():
            att = acc_scr[...] * pl.reciprocal(l_scr[...], approx=True)   # (tq, C_pad)
            # (tq, C_pad) -> (C_pad, tq), exact f32 MXU identity transpose.
            rows = jax.lax.broadcasted_iota(jnp.int32, (C_pad, C_pad), 0)
            cols = jax.lax.broadcasted_iota(jnp.int32, (C_pad, C_pad), 1)
            eye_c = (rows == cols).astype(jnp.float32)
            att_cm = jax.lax.dot_general(eye_c, att, (((1,), (1,)), ((), ())),
                                         preferred_element_type=jnp.float32)  # (C_pad, tq)
            out_gc = gacc_scr[...] * pl.reciprocal(gl_scr[...], approx=True)  # (C_pad, 1)
            o_ref[0] = (xq_ref[0]
                        + gamma_ref[0] * att_cm[:C]
                        + out_gc[:C])
    return kernel


def nonlocal_gc_forward(x_nchw, params, planes, *, tq=256, tk=512):
    wq, bq, wk, bk, wv, wm, bm, gamma = params
    B, C, H, W = x_nchw.shape
    N = H * W
    P = planes
    P_pad = _round_up(P, 8)
    C_pad = _round_up(C, 8)
    KVM = P_pad + C_pad + 8       # key rows | value rows | mask row, each 8-sublane aligned

    tq = min(tq, N)
    tk = min(tk, N)
    assert N % tq == 0 and N % tk == 0 and (tq % 128 == 0 or tq == N) \
        and (tk % 128 == 0 or tk == N), "spatial size must tile cleanly"
    # TODO(synk): ragged N (pad + mask the tail kv tile) is not handled.

    # NCHW kept as-is: (B, C, N) is a free reshape, no wrapper transpose round trip.
    x = x_nchw.reshape(B, C, N).astype(jnp.float32)

    # Pre-transposed / padded / fused weights (bf16 for the MXU, f32 biases).
    wq_t = jnp.zeros((P_pad, C), jnp.float32).at[:P].set(wq.T).astype(jnp.bfloat16)
    bq_p = jnp.zeros((P_pad, 1), jnp.float32).at[:P, 0].set(bq.reshape(-1))
    w_kvm = jnp.zeros((KVM, C), jnp.float32)
    w_kvm = w_kvm.at[:P].set(wk.T)
    w_kvm = w_kvm.at[P_pad:P_pad + C].set(wv.T)
    w_kvm = w_kvm.at[P_pad + C_pad].set(wm.reshape(-1))
    w_kvm = w_kvm.astype(jnp.bfloat16)
    b_kvm = jnp.zeros((KVM, 1), jnp.float32)
    b_kvm = b_kvm.at[:P, 0].set(bk.reshape(-1))
    b_kvm = b_kvm.at[P_pad + C_pad, 0].set(bm.reshape(-1)[0])

    gamma_s = gamma.reshape(-1).astype(jnp.float32)   # (1,) scalar, lives in SMEM

    inv_scale = 1.0 / math.sqrt(planes)
    nq, nk = N // tq, N // tk
    grid = (B, nq, nk)

    kernel = _make_nlgc_kernel(C=C, P_pad=P_pad, C_pad=C_pad, tq=tq,
                               inv_scale=inv_scale)

    flops = 2 * B * N * C * (2 * P + C + 1) + 2 * B * N * N * (P + C)
    transcendentals = B * N * N + 2 * B * N
    bytes_accessed = int(4 * x.size * (2 + nq)
                         + 2 * (wq_t.size + w_kvm.size)
                         + 4 * (bq_p.size + b_kvm.size))

    out = pl.pallas_call(
        kernel,
        out_shape=jax.ShapeDtypeStruct((B, C, N), jnp.float32),
        grid_spec=pltpu.PrefetchScalarGridSpec(
            num_scalar_prefetch=0,
            grid=grid,
            in_specs=[
                pl.BlockSpec(memory_space=pltpu.MemorySpace.SMEM),        # gamma (scalar)
                pl.BlockSpec((1, C, tq), lambda b, qi, ki: (b, 0, qi)),   # x, query tile
                pl.BlockSpec((1, C, tk), lambda b, qi, ki: (b, 0, ki)),   # x, kv tile
                pl.BlockSpec((P_pad, C), lambda b, qi, ki: (0, 0)),       # Wq^T (padded)
                pl.BlockSpec((P_pad, 1), lambda b, qi, ki: (0, 0)),       # bq (padded)
                pl.BlockSpec((KVM, C), lambda b, qi, ki: (0, 0)),         # fused [Wk;Wv;Wm]^T
                pl.BlockSpec((KVM, 1), lambda b, qi, ki: (0, 0)),         # fused [bk;0;bm]
            ],
            out_specs=pl.BlockSpec((1, C, tq), lambda b, qi, ki: (b, 0, qi)),
            scratch_shapes=[
                pltpu.VMEM((tq, P_pad), jnp.bfloat16),   # query tile (scaled, bf16)
                pltpu.VMEM((tq, 1), jnp.float32),        # attn running max
                pltpu.VMEM((tq, 1), jnp.float32),        # attn running sum
                pltpu.VMEM((tq, C_pad), jnp.float32),    # attn accumulator
                pltpu.VMEM((1, 1), jnp.float32),         # gc running max
                pltpu.VMEM((1, 1), jnp.float32),         # gc running sum
                pltpu.VMEM((C_pad, 1), jnp.float32),     # gc accumulator
            ]),
        compiler_params=pltpu.CompilerParams(
            dimension_semantics=("parallel", "parallel", "arbitrary"),
            # sized for v7x's 64 MiB physical VMEM; plenty of headroom on v5e/v6e
            vmem_limit_bytes=48 * 1024 * 1024),
        cost_estimate=pl.CostEstimate(flops=flops,
                                      transcendentals=transcendentals,
                                      bytes_accessed=bytes_accessed),
    )(gamma_s, x, x, wq_t, bq_p, w_kvm, b_kvm)

    return out.reshape(B, C, H, W)


def nonlocal_gc_reference(x_nchw, params, planes):
    """Pure-JAX mirror of the PyTorch forward (NCHW semantics)."""
    wq, bq, wk, bk, wv, wm, bm, gamma = params
    B, C, H, W = x_nchw.shape
    N = H * W
    scale = math.sqrt(planes)
    xf = x_nchw.reshape(B, C, N)

    query = jnp.einsum('oc,bcn->bon', wq.T, xf) + bq.reshape(1, -1, 1)
    key = jnp.einsum('oc,bcn->bon', wk.T, xf) + bk.reshape(1, -1, 1)
    value = jnp.einsum('oc,bcn->bon', wv.T, xf)
    mask = jnp.einsum('oc,bcn->bon', wm.T, xf) + bm.reshape(1, -1, 1)

    sim = jnp.einsum('bpn,bpm->bnm', query, key) / scale
    sim = jax.nn.softmax(sim, axis=2)
    mask = jax.nn.softmax(mask, axis=2)

    out_sim = jnp.einsum('bnm,bcm->bcn', sim, value)
    out_sim = gamma[0, 0] * out_sim.reshape(B, C, H, W)

    out_gc = jnp.einsum('bcn,bn->bc', value, mask[:, 0, :]).reshape(B, C, 1, 1)
    return x_nchw + out_sim + out_gc


def init_params(key, inplanes, planes):
    ks = jax.random.split(key, 4)
    # conv weights ~ N(0, 0.01), biases zero (matches reset_parameters)
    wq = 0.01 * jax.random.normal(ks[0], (inplanes, planes), jnp.float32)
    wk = 0.01 * jax.random.normal(ks[1], (inplanes, planes), jnp.float32)
    wv = 0.01 * jax.random.normal(ks[2], (inplanes, inplanes), jnp.float32)
    wm = 0.01 * jax.random.normal(ks[3], (inplanes, 1), jnp.float32)
    bq = jnp.zeros((1, planes), jnp.float32)
    bk = jnp.zeros((1, planes), jnp.float32)
    bm = jnp.zeros((1, 1), jnp.float32)
    # module inits gamma to 0; use a nonzero value so the attention branch is exercised.
    gamma = jnp.full((1, 1), 0.1, jnp.float32)
    return (wq, bq, wk, bk, wv, wm, bm, gamma)


if __name__ == "__main__":
    B, C, H, W = 2, 4, 16, 16
    planes = C // 2

    key = jax.random.PRNGKey(0)
    kx, kp = jax.random.split(key)
    x = jax.random.normal(kx, (B, C, H, W), jnp.float32)
    params = init_params(kp, C, planes)

    # tq/tk = 128 so the test exercises multiple query tiles and multiple
    # online-softmax kv steps (N = 256).
    out = nonlocal_gc_forward(x, params, planes, tq=128, tk=128)
    out = jax.block_until_ready(out)

    ref = jax.block_until_ready(nonlocal_gc_reference(x, params, planes))
    # bf16 MXU inputs + approx reciprocal -> slightly looser tolerances than pure f32.
    np.testing.assert_allclose(np.asarray(out), np.asarray(ref), rtol=5e-3, atol=2e-3)

    # TODO(synk): downsample (MaxPool), use_out (conv_out) and add_conv ('one_fc'/'two_fc')
    # branches are not instantiated in this config and are left unimplemented.
    print("KERNEL_OK")
</pallas_src>

<mosaic_0001>
module attributes {stable_mosaic.version = 11 : i64} {
  func.func @kernel(%arg0: i32, %arg1: i32, %arg2: i32, %arg3: memref<1xf32, #tpu.memory_space<smem>>, %arg4: memref<1x4x128xf32, #tpu.memory_space<vmem>>, %arg5: memref<1x4x128xf32, #tpu.memory_space<vmem>>, %arg6: memref<8x4xbf16, #tpu.memory_space<vmem>>, %arg7: memref<8x1xf32, #tpu.memory_space<vmem>>, %arg8: memref<24x4xbf16, #tpu.memory_space<vmem>>, %arg9: memref<24x1xf32, #tpu.memory_space<vmem>>, %arg10: memref<1x4x128xf32, #tpu.memory_space<vmem>>, %arg11: memref<128x8xbf16, #tpu.memory_space<vmem>>, %arg12: memref<128x1xf32, #tpu.memory_space<vmem>>, %arg13: memref<128x1xf32, #tpu.memory_space<vmem>>, %arg14: memref<128x8xf32, #tpu.memory_space<vmem>>, %arg15: memref<1x1xf32, #tpu.memory_space<vmem>>, %arg16: memref<1x1xf32, #tpu.memory_space<vmem>>, %arg17: memref<8x1xf32, #tpu.memory_space<vmem>>) attributes {dimension_semantics = [#tpu.dimension_semantics<parallel>, #tpu.dimension_semantics<parallel>, #tpu.dimension_semantics<arbitrary>], iteration_bounds = array<i64: 2, 2, 2>, scalar_prefetch = 0 : i64, scratch_operands = 7 : i64, tpu.core_type = #tpu.core_type<tc>, window_params = [{transform_indices = @transform_0, window_bounds = array<i64: 1>}, {transform_indices = @transform_1, window_bounds = array<i64: 1, 4, 128>}, {transform_indices = @transform_2, window_bounds = array<i64: 1, 4, 128>}, {pipeline_mode = #tpu.pipeline_mode<synchronous>, transform_indices = @transform_3, window_bounds = array<i64: 8, 4>}, {pipeline_mode = #tpu.pipeline_mode<synchronous>, transform_indices = @transform_4, window_bounds = array<i64: 8, 1>}, {pipeline_mode = #tpu.pipeline_mode<synchronous>, transform_indices = @transform_5, window_bounds = array<i64: 24, 4>}, {pipeline_mode = #tpu.pipeline_mode<synchronous>, transform_indices = @transform_6, window_bounds = array<i64: 24, 1>}, {transform_indices = @transform_7, window_bounds = array<i64: 1, 4, 128>}]} {
    %c0_i32 = arith.constant 0 : i32
    %0 = arith.cmpi eq, %arg2, %c0_i32 : i32
    %1 = arith.extui %0 : i1 to i32
    %c0_i32_0 = arith.constant 0 : i32
    %2 = arith.cmpi ne, %1, %c0_i32_0 : i32
    scf.if %2 {
      %c0_41 = arith.constant 0 : index
      %c0_42 = arith.constant 0 : index
      %c0_43 = arith.constant 0 : index
      %69 = vector.load %arg4[%c0_41, %c0_42, %c0_43] : memref<1x4x128xf32, #tpu.memory_space<vmem>>, vector<1x4x128xf32>
      %70 = vector.shape_cast %69 : vector<1x4x128xf32> to vector<4x128xf32>
      %71 = arith.truncf %70 : vector<4x128xf32> to vector<4x128xbf16>
      %c0_44 = arith.constant 0 : index
      %c0_45 = arith.constant 0 : index
      %72 = vector.load %arg6[%c0_44, %c0_45] : memref<8x4xbf16, #tpu.memory_space<vmem>>, vector<8x4xbf16>
      %cst_46 = arith.constant dense<0.000000e+00> : vector<8x128xf32>
      %73 = tpu.matmul %72, %71, %cst_46 {dimension_numbers = #tpu.dot_dimension_numbers<[1], [0], [0], [1], [0, 0, 1, 1], [], []>} : vector<8x4xbf16>, vector<4x128xbf16>, vector<8x128xf32> -> vector<8x128xf32>
      %c0_47 = arith.constant 0 : index
      %c0_48 = arith.constant 0 : index
      %74 = vector.load %arg7[%c0_47, %c0_48] : memref<8x1xf32, #tpu.memory_space<vmem>>, vector<8x1xf32>
      %75 = vector.broadcast %74 : vector<8x1xf32> to vector<8x128xf32>
      %76 = arith.addf %73, %75 : vector<8x128xf32>
      %cst_49 = arith.constant 0.707106769 : f32
      %77 = vector.broadcast %cst_49 : f32 to vector<8x128xf32>
      %78 = arith.mulf %76, %77 : vector<8x128xf32>
      %79 = tpu.iota {dimensions = array<i32: 0>} : vector<128x128xi32>
      %80 = tpu.iota {dimensions = array<i32: 1>} : vector<128x128xi32>
      %81 = arith.cmpi eq, %79, %80 : vector<128x128xi32>
      %82 = arith.extui %81 : vector<128x128xi1> to vector<128x128xi32>
      %83 = arith.sitofp %82 : vector<128x128xi32> to vector<128x128xf32>
      %cst_50 = arith.constant dense<0.000000e+00> : vector<128x8xf32>
      %84 = tpu.matmul %83, %78, %cst_50 {dimension_numbers = #tpu.dot_dimension_numbers<[1], [1], [0], [0], [0, 0, 1, 0], [], []>} : vector<128x128xf32>, vector<8x128xf32>, vector<128x8xf32> -> vector<128x8xf32>
      %85 = arith.truncf %84 : vector<128x8xf32> to vector<128x8xbf16>
      %c0_51 = arith.constant 0 : index
      %c0_52 = arith.constant 0 : index
      %86 = vector.load %arg11[%c0_51, %c0_52] : memref<128x8xbf16, #tpu.memory_space<vmem>>, vector<128x8xbf16>
      tpu.vector_store %arg11[%c0_51, %c0_52], %85 {strides = array<i32>} : memref<128x8xbf16, #tpu.memory_space<vmem>>, vector<128x8xbf16>,
      %cst_53 = arith.constant 0xFF800000 : f32
      %87 = vector.broadcast %cst_53 : f32 to vector<128x1xf32>
      %c0_54 = arith.constant 0 : index
      %c0_55 = arith.constant 0 : index
      %88 = vector.load %arg12[%c0_54, %c0_55] : memref<128x1xf32, #tpu.memory_space<vmem>>, vector<128x1xf32>
      tpu.vector_store %arg12[%c0_54, %c0_55], %87 {strides = array<i32>} : memref<128x1xf32, #tpu.memory_space<vmem>>, vector<128x1xf32>,
      %cst_56 = arith.constant 0.000000e+00 : f32
      %89 = vector.broadcast %cst_56 : f32 to vector<128x1xf32>
      %c0_57 = arith.constant 0 : index
      %c0_58 = arith.constant 0 : index
      %90 = vector.load %arg13[%c0_57, %c0_58] : memref<128x1xf32, #tpu.memory_space<vmem>>, vector<128x1xf32>
      tpu.vector_store %arg13[%c0_57, %c0_58], %89 {strides = array<i32>} : memref<128x1xf32, #tpu.memory_space<vmem>>, vector<128x1xf32>,
      %cst_59 = arith.constant 0.000000e+00 : f32
      %91 = vector.broadcast %cst_59 : f32 to vector<128x8xf32>
      %c0_60 = arith.constant 0 : index
      %c0_61 = arith.constant 0 : index
      %92 = vector.load %arg14[%c0_60, %c0_61] : memref<128x8xf32, #tpu.memory_space<vmem>>, vector<128x8xf32>
      tpu.vector_store %arg14[%c0_60, %c0_61], %91 {strides = array<i32>} : memref<128x8xf32, #tpu.memory_space<vmem>>, vector<128x8xf32>,
      %cst_62 = arith.constant 0xFF800000 : f32
      %93 = vector.broadcast %cst_62 : f32 to vector<1x1xf32>
      %c0_63 = arith.constant 0 : index
      %c0_64 = arith.constant 0 : index
      %94 = vector.load %arg15[%c0_63, %c0_64] : memref<1x1xf32, #tpu.memory_space<vmem>>, vector<1x1xf32>
      tpu.vector_store %arg15[%c0_63, %c0_64], %93 {strides = array<i32>} : memref<1x1xf32, #tpu.memory_space<vmem>>, vector<1x1xf32>,
      %cst_65 = arith.constant 0.000000e+00 : f32
      %95 = vector.broadcast %cst_65 : f32 to vector<1x1xf32>
      %c0_66 = arith.constant 0 : index
      %c0_67 = arith.constant 0 : index
      %96 = vector.load %arg16[%c0_66, %c0_67] : memref<1x1xf32, #tpu.memory_space<vmem>>, vector<1x1xf32>
      tpu.vector_store %arg16[%c0_66, %c0_67], %95 {strides = array<i32>} : memref<1x1xf32, #tpu.memory_space<vmem>>, vector<1x1xf32>,
      %cst_68 = arith.constant 0.000000e+00 : f32
      %97 = vector.broadcast %cst_68 : f32 to vector<8x1xf32>
      %c0_69 = arith.constant 0 : index
      %c0_70 = arith.constant 0 : index
      %98 = vector.load %arg17[%c0_69, %c0_70] : memref<8x1xf32, #tpu.memory_space<vmem>>, vector<8x1xf32>
      tpu.vector_store %arg17[%c0_69, %c0_70], %97 {strides = array<i32>} : memref<8x1xf32, #tpu.memory_space<vmem>>, vector<8x1xf32>,
    } else {
    }
    %c0 = arith.constant 0 : index
    %c0_1 = arith.constant 0 : index
    %c0_2 = arith.constant 0 : index
    %3 = vector.load %arg5[%c0, %c0_1, %c0_2] : memref<1x4x128xf32, #tpu.memory_space<vmem>>, vector<1x4x128xf32>
    %4 = vector.shape_cast %3 : vector<1x4x128xf32> to vector<4x128xf32>
    %5 = arith.truncf %4 : vector<4x128xf32> to vector<4x128xbf16>
    %c0_3 = arith.constant 0 : index
    %c0_4 = arith.constant 0 : index
    %6 = vector.load %arg8[%c0_3, %c0_4] : memref<24x4xbf16, #tpu.memory_space<vmem>>, vector<24x4xbf16>
    %cst = arith.constant dense<0.000000e+00> : vector<24x128xf32>
    %7 = tpu.matmul %6, %5, %cst {dimension_numbers = #tpu.dot_dimension_numbers<[1], [0], [0], [1], [0, 0, 1, 1], [], []>} : vector<24x4xbf16>, vector<4x128xbf16>, vector<24x128xf32> -> vector<24x128xf32>
    %c0_5 = arith.constant 0 : index
    %c0_6 = arith.constant 0 : index
    %8 = vector.load %arg9[%c0_5, %c0_6] : memref<24x1xf32, #tpu.memory_space<vmem>>, vector<24x1xf32>
    %9 = vector.broadcast %8 : vector<24x1xf32> to vector<24x128xf32>
    %10 = arith.addf %7, %9 : vector<24x128xf32>
    %11 = vector.extract_strided_slice %10 {offsets = [0, 0], sizes = [8, 128], strides = [1, 1]} : vector<24x128xf32> to vector<8x128xf32>
    %12 = vector.extract_strided_slice %10 {offsets = [8, 0], sizes = [8, 128], strides = [1, 1]} : vector<24x128xf32> to vector<8x128xf32>
    %13 = vector.extract_strided_slice %10 {offsets = [16, 0], sizes = [1, 128], strides = [1, 1]} : vector<24x128xf32> to vector<1x128xf32>
    %c0_7 = arith.constant 0 : index
    %c0_8 = arith.constant 0 : index
    %14 = vector.load %arg11[%c0_7, %c0_8] : memref<128x8xbf16, #tpu.memory_space<vmem>>, vector<128x8xbf16>
    %15 = arith.truncf %11 : vector<8x128xf32> to vector<8x128xbf16>
    %cst_9 = arith.constant dense<0.000000e+00> : vector<128x128xf32>
    %16 = tpu.matmul %14, %15, %cst_9 {dimension_numbers = #tpu.dot_dimension_numbers<[1], [0], [0], [1], [0, 0, 1, 1], [], []>} : vector<128x8xbf16>, vector<8x128xbf16>, vector<128x128xf32> -> vector<128x128xf32>
    %c0_10 = arith.constant 0 : index
    %c0_11 = arith.constant 0 : index
    %17 = vector.load %arg12[%c0_10, %c0_11] : memref<128x1xf32, #tpu.memory_space<vmem>>, vector<128x1xf32>
    %cst_12 = arith.constant dense<0xFF800000> : vector<128xf32>
    %18 = vector.multi_reduction <maximumf>, %16, %cst_12 [1] : vector<128x128xf32> to vector<128xf32>
    %19 = vector.shape_cast %18 : vector<128xf32> to vector<128x1xf32>
    %20 = arith.maximumf %17, %19 : vector<128x1xf32>
    %21 = arith.subf %17, %20 : vector<128x1xf32>
    %22 = math.exp %21 : vector<128x1xf32>
    %23 = vector.broadcast %20 : vector<128x1xf32> to vector<128x128xf32>
    %24 = arith.subf %16, %23 : vector<128x128xf32>
    %25 = math.exp %24 : vector<128x128xf32>
    %c0_13 = arith.constant 0 : index
    %c0_14 = arith.constant 0 : index
    %26 = vector.load %arg13[%c0_13, %c0_14] : memref<128x1xf32, #tpu.memory_space<vmem>>, vector<128x1xf32>
    %27 = arith.mulf %22, %26 : vector<128x1xf32>
    %cst_15 = arith.constant dense<0.000000e+00> : vector<128xf32>
    %28 = vector.multi_reduction <add>, %25, %cst_15 [1] : vector<128x128xf32> to vector<128xf32>
    %29 = vector.shape_cast %28 : vector<128xf32> to vector<128x1xf32>
    %30 = arith.addf %27, %29 : vector<128x1xf32>
    %c0_16 = arith.constant 0 : index
    %c0_17 = arith.constant 0 : index
    %31 = vector.load %arg13[%c0_16, %c0_17] : memref<128x1xf32, #tpu.memory_space<vmem>>, vector<128x1xf32>
    tpu.vector_store %arg13[%c0_16, %c0_17], %30 {strides = array<i32>} : memref<128x1xf32, #tpu.memory_space<vmem>>, vector<128x1xf32>,
    %c0_18 = arith.constant 0 : index
    %c0_19 = arith.constant 0 : index
    %32 = vector.load %arg14[%c0_18, %c0_19] : memref<128x8xf32, #tpu.memory_space<vmem>>, vector<128x8xf32>
    %33 = vector.broadcast %22 : vector<128x1xf32> to vector<128x8xf32>
    %34 = arith.mulf %33, %32 : vector<128x8xf32>
    %35 = arith.truncf %25 : vector<128x128xf32> to vector<128x128xbf16>
    %36 = arith.truncf %12 : vector<8x128xf32> to vector<8x128xbf16>
    %cst_20 = arith.constant dense<0.000000e+00> : vector<128x8xf32>
    %37 = tpu.matmul %35, %36, %cst_20 {dimension_numbers = #tpu.dot_dimension_numbers<[1], [1], [0], [0], [0, 0, 1, 0], [], []>} : vector<128x128xbf16>, vector<8x128xbf16>, vector<128x8xf32> -> vector<128x8xf32>
    %38 = arith.addf %34, %37 : vector<128x8xf32>
    %c0_21 = arith.constant 0 : index
    %c0_22 = arith.constant 0 : index
    %39 = vector.load %arg14[%c0_21, %c0_22] : memref<128x8xf32, #tpu.memory_space<vmem>>, vector<128x8xf32>
    tpu.vector_store %arg14[%c0_21, %c0_22], %38 {strides = array<i32>} : memref<128x8xf32, #tpu.memory_space<vmem>>, vector<128x8xf32>,
    %c0_23 = arith.constant 0 : index
    %c0_24 = arith.constant 0 : index
    %40 = vector.load %arg12[%c0_23, %c0_24] : memref<128x1xf32, #tpu.memory_space<vmem>>, vector<128x1xf32>
    tpu.vector_store %arg12[%c0_23, %c0_24], %20 {strides = array<i32>} : memref<128x1xf32, #tpu.memory_space<vmem>>, vector<128x1xf32>,
    %c0_25 = arith.constant 0 : index
    %c0_26 = arith.constant 0 : index
    %41 = vector.load %arg15[%c0_25, %c0_26] : memref<1x1xf32, #tpu.memory_space<vmem>>, vector<1x1xf32>
    %cst_27 = arith.constant dense<0xFF800000> : vector<1xf32>
    %42 = vector.multi_reduction <maximumf>, %13, %cst_27 [1] : vector<1x128xf32> to vector<1xf32>
    %43 = vector.shape_cast %42 : vector<1xf32> to vector<1x1xf32>
    %44 = arith.maximumf %41, %43 : vector<1x1xf32>
    %45 = arith.subf %41, %44 : vector<1x1xf32>
    %46 = math.exp %45 : vector<1x1xf32>
    %47 = vector.broadcast %44 : vector<1x1xf32> to vector<1x128xf32>
    %48 = arith.subf %13, %47 : vector<1x128xf32>
    %49 = math.exp %48 : vector<1x128xf32>
    %c0_28 = arith.constant 0 : index
    %c0_29 = arith.constant 0 : index
    %50 = vector.load %arg16[%c0_28, %c0_29] : memref<1x1xf32, #tpu.memory_space<vmem>>, vector<1x1xf32>
    %51 = arith.mulf %46, %50 : vector<1x1xf32>
    %cst_30 = arith.constant dense<0.000000e+00> : vector<1xf32>
    %52 = vector.multi_reduction <add>, %49, %cst_30 [1] : vector<1x128xf32> to vector<1xf32>
    %53 = vector.shape_cast %52 : vector<1xf32> to vector<1x1xf32>
    %54 = arith.addf %51, %53 : vector<1x1xf32>
    %c0_31 = arith.constant 0 : index
    %c0_32 = arith.constant 0 : index
    %55 = vector.load %arg16[%c0_31, %c0_32] : memref<1x1xf32, #tpu.memory_space<vmem>>, vector<1x1xf32>
    tpu.vector_store %arg16[%c0_31, %c0_32], %54 {strides = array<i32>} : memref<1x1xf32, #tpu.memory_space<vmem>>, vector<1x1xf32>,
    %c0_33 = arith.constant 0 : index
    %c0_34 = arith.constant 0 : index
    %56 = vector.load %arg17[%c0_33, %c0_34] : memref<8x1xf32, #tpu.memory_space<vmem>>, vector<8x1xf32>
    %57 = vector.broadcast %46 : vector<1x1xf32> to vector<8x1xf32>
    %58 = arith.mulf %57, %56 : vector<8x1xf32>
    %59 = vector.broadcast %49 : vector<1x128xf32> to vector<8x128xf32>
    %60 = arith.mulf %12, %59 : vector<8x128xf32>
    %cst_35 = arith.constant dense<0.000000e+00> : vector<8xf32>
    %61 = vector.multi_reduction <add>, %60, %cst_35 [1] : vector<8x128xf32> to vector<8xf32>
    %62 = vector.shape_cast %61 : vector<8xf32> to vector<8x1xf32>
    %63 = arith.addf %58, %62 : vector<8x1xf32>
    %c0_36 = arith.constant 0 : index
    %c0_37 = arith.constant 0 : index
    %64 = vector.load %arg17[%c0_36, %c0_37] : memref<8x1xf32, #tpu.memory_space<vmem>>, vector<8x1xf32>
    tpu.vector_store %arg17[%c0_36, %c0_37], %63 {strides = array<i32>} : memref<8x1xf32, #tpu.memory_space<vmem>>, vector<8x1xf32>,
    %c0_38 = arith.constant 0 : index
    %c0_39 = arith.constant 0 : index
    %65 = vector.load %arg15[%c0_38, %c0_39] : memref<1x1xf32, #tpu.memory_space<vmem>>, vector<1x1xf32>
    tpu.vector_store %arg15[%c0_38, %c0_39], %44 {strides = array<i32>} : memref<1x1xf32, #tpu.memory_space<vmem>>, vector<1x1xf32>,
    %c1_i32 = arith.constant 1 : i32
    %66 = arith.cmpi eq, %arg2, %c1_i32 : i32
    %67 = arith.extui %66 : i1 to i32
    %c0_i32_40 = arith.constant 0 : i32
    %68 = arith.cmpi ne, %67, %c0_i32_40 : i32
    scf.if %68 {
      %c0_41 = arith.constant 0 : index
      %c0_42 = arith.constant 0 : index
      %69 = vector.load %arg14[%c0_41, %c0_42] : memref<128x8xf32, #tpu.memory_space<vmem>>, vector<128x8xf32>
      %c0_43 = arith.constant 0 : index
      %c0_44 = arith.constant 0 : index
      %70 = vector.load %arg13[%c0_43, %c0_44] : memref<128x1xf32, #tpu.memory_space<vmem>>, vector<128x1xf32>
      %71 = tpu.reciprocal %70 {approx = true} : vector<128x1xf32> -> vector<128x1xf32>
      %72 = vector.broadcast %71 : vector<128x1xf32> to vector<128x8xf32>
      %73 = arith.mulf %69, %72 : vector<128x8xf32>
      %74 = tpu.iota {dimensions = array<i32: 0>} : vector<8x8xi32>
      %75 = tpu.iota {dimensions = array<i32: 1>} : vector<8x8xi32>
      %76 = arith.cmpi eq, %74, %75 : vector<8x8xi32>
      %77 = arith.extui %76 : vector<8x8xi1> to vector<8x8xi32>
      %78 = arith.sitofp %77 : vector<8x8xi32> to vector<8x8xf32>
      %cst_45 = arith.constant dense<0.000000e+00> : vector<8x128xf32>
      %79 = tpu.matmul %78, %73, %cst_45 {dimension_numbers = #tpu.dot_dimension_numbers<[1], [1], [0], [0], [0, 0, 1, 0], [], []>} : vector<8x8xf32>, vector<128x8xf32>, vector<8x128xf32> -> vector<8x128xf32>
      %c0_46 = arith.constant 0 : index
      %c0_47 = arith.constant 0 : index
      %80 = vector.load %arg17[%c0_46, %c0_47] : memref<8x1xf32, #tpu.memory_space<vmem>>, vector<8x1xf32>
      %c0_48 = arith.constant 0 : index
      %c0_49 = arith.constant 0 : index
      %81 = vector.load %arg16[%c0_48, %c0_49] : memref<1x1xf32, #tpu.memory_space<vmem>>, vector<1x1xf32>
      %82 = tpu.reciprocal %81 {approx = true} : vector<1x1xf32> -> vector<1x1xf32>
      %83 = vector.broadcast %82 : vector<1x1xf32> to vector<8x1xf32>
      %84 = arith.mulf %80, %83 : vector<8x1xf32>
      %c0_50 = arith.constant 0 : index
      %c0_51 = arith.constant 0 : index
      %c0_52 = arith.constant 0 : index
      %85 = vector.load %arg4[%c0_50, %c0_51, %c0_52] : memref<1x4x128xf32, #tpu.memory_space<vmem>>, vector<1x4x128xf32>
      %86 = vector.shape_cast %85 : vector<1x4x128xf32> to vector<4x128xf32>
      %c0_53 = arith.constant 0 : index
      %87 = memref.load %arg3[%c0_53] : memref<1xf32, #tpu.memory_space<smem>>
      %88 = vector.extract_strided_slice %79 {offsets = [0, 0], sizes = [4, 128], strides = [1, 1]} : vector<8x128xf32> to vector<4x128xf32>
      %89 = vector.broadcast %87 : f32 to vector<4x128xf32>
      %90 = arith.mulf %89, %88 : vector<4x128xf32>
      %91 = arith.addf %86, %90 : vector<4x128xf32>
      %92 = vector.extract_strided_slice %84 {offsets = [0, 0], sizes = [4, 1], strides = [1, 1]} : vector<8x1xf32> to vector<4x1xf32>
      %93 = vector.broadcast %92 : vector<4x1xf32> to vector<4x128xf32>
      %94 = arith.addf %91, %93 : vector<4x128xf32>
      %c0_54 = arith.constant 0 : index
      %c0_55 = arith.constant 0 : index
      %c0_56 = arith.constant 0 : index
      %95 = vector.load %arg10[%c0_54, %c0_55, %c0_56] : memref<1x4x128xf32, #tpu.memory_space<vmem>>, vector<1x4x128xf32>
      %96 = vector.shape_cast %95 : vector<1x4x128xf32> to vector<4x128xf32>
      %97 = vector.shape_cast %94 : vector<4x128xf32> to vector<1x4x128xf32>
      tpu.vector_store %arg10[%c0_54, %c0_55, %c0_56], %97 {strides = array<i32>} : memref<1x4x128xf32, #tpu.memory_space<vmem>>, vector<1x4x128xf32>,
    } else {
    }
    return
  }
  func.func @transform_0(%arg0: i32, %arg1: i32, %arg2: i32) -> i32 {
    %c0_i32 = arith.constant 0 : i32
    %c0_i32_0 = arith.constant 0 : i32
    return %c0_i32 : i32
  }
  func.func @transform_1(%arg0: i32, %arg1: i32, %arg2: i32) -> (i32, i32, i32) {
    %c0_i32 = arith.constant 0 : i32
    %c0_i32_0 = arith.constant 0 : i32
    return %arg0, %c0_i32, %arg1 : i32, i32, i32
  }
  func.func @transform_2(%arg0: i32, %arg1: i32, %arg2: i32) -> (i32, i32, i32) {
    %c0_i32 = arith.constant 0 : i32
    %c0_i32_0 = arith.constant 0 : i32
    return %arg0, %c0_i32, %arg2 : i32, i32, i32
  }
  func.func @transform_3(%arg0: i32, %arg1: i32, %arg2: i32) -> (i32, i32) {
    %c0_i32 = arith.constant 0 : i32
    %c0_i32_0 = arith.constant 0 : i32
    %c0_i32_1 = arith.constant 0 : i32
    return %c0_i32, %c0_i32_0 : i32, i32
  }
  func.func @transform_4(%arg0: i32, %arg1: i32, %arg2: i32) -> (i32, i32) {
    %c0_i32 = arith.constant 0 : i32
    %c0_i32_0 = arith.constant 0 : i32
    %c0_i32_1 = arith.constant 0 : i32
    return %c0_i32, %c0_i32_0 : i32, i32
  }
  func.func @transform_5(%arg0: i32, %arg1: i32, %arg2: i32) -> (i32, i32) {
    %c0_i32 = arith.constant 0 : i32
    %c0_i32_0 = arith.constant 0 : i32
    %c0_i32_1 = arith.constant 0 : i32
    return %c0_i32, %c0_i32_0 : i32, i32
  }
  func.func @transform_6(%arg0: i32, %arg1: i32, %arg2: i32) -> (i32, i32) {
    %c0_i32 = arith.constant 0 : i32
    %c0_i32_0 = arith.constant 0 : i32
    %c0_i32_1 = arith.constant 0 : i32
    return %c0_i32, %c0_i32_0 : i32, i32
  }
  func.func @transform_7(%arg0: i32, %arg1: i32, %arg2: i32) -> (i32, i32, i32) {
    %c0_i32 = arith.constant 0 : i32
    %c0_i32_0 = arith.constant 0 : i32
    return %arg0, %c0_i32, %arg1 : i32, i32, i32
  }
}

</mosaic_0001>

<bundles_post_ra>
// kernel: tpu_custom_call.1
= control target key start
LH: loop header
LB: loop body
LE: loop exit
PB: predicated region body
PF: predicated region fallthrough
CT: control target
= control target key end

     0   :  { %s3501_s0 = inlined_call_operand.<no memory space> [shape: f32[1], index: 0, kind: input, shape index: {}]   ;;  %s3502_s1 = inlined_call_operand.vmem [shape: f32[2,4,256], index: 1, kind: input, shape index: {}]   ;;  %s3503_s2 = inlined_call_operand.vmem [shape: f32[2,4,256], index: 2, kind: input, shape index: {}]   ;;  %s3504_s3 = inlined_call_operand.vmem [shape: bf16[8,4], index: 3, kind: input, shape index: {}]   ;;  %s3505_s4 = inlined_call_operand.vmem [shape: f32[8,1], index: 4, kind: input, shape index: {}]   ;;  %s3506_s5 = inlined_call_operand.vmem [shape: bf16[24,4], index: 5, kind: input, shape index: {}]   ;;  %s3507_s6 = inlined_call_operand.vmem [shape: f32[24,1], index: 6, kind: input, shape index: {}]   ;;  %s3508_s7 = inlined_call_operand.hbm [shape: f32[2,4,256], index: 7, kind: output, shape index: {}]  }
   0x1   :  { %12 = sst [smem:[#allocation9]] %s3501_s0 }
   0x2   :  { %13 = vsyncpa [#allocation11], 0 }
   0x3   :  { %15 = vsyncpa [#allocation11 + $0x1], 0  ;;  %s2631_s26 = smov 0   ;;  %s2633_s27 = smov 0  }
   0x4   :  { %s2635_s28 = smov 0   ;;  %s2637_s29 = smov 0  }
   0x5   :  { %s2639_s30 = smov 0   ;;  %s2641_s8 = smov 0  }
   0x6   :  { %s2643_s9 = smov 0   ;;  %s2645_s10 = smov 0  }
   0x7   :  { %s2647_s11 = smov 0   ;;  %s2649_s0 = smov 0  }
   0x8 LB: > { %3519 = sst [smem:[#allocation13_spill]] %s2547_s28  ;;  %s1977_s12 = sadd.s32 4294967295, %s2575_s0   ;;  %s2575_s0 = sphi %s2649_s0, %s21_s0   ;;  %s2571_s11 = sphi %s2647_s11, %s3591_s11   ;;  %s2567_s10 = sphi %s2645_s10, %s3590_s10   ;;  %s2563_s9 = sphi %s2643_s9, %s3589_s9   ;;  %s2559_s8 = sphi %s2641_s8, %s3588_s8   ;;  %s2555_s30 = sphi %s2639_s30, %s3587_s30   ;;  %s2551_s29 = sphi %s2637_s29, %s3586_s29   ;;  %s2547_s28 = sphi %s2635_s28, %s3585_s28   ;;  %s2543_s27 = sphi %s2633_s27, %s3593_s27   ;;  %s2539_s26 = sphi %s2631_s26, %s3592_s26  }
   0x9   : > { %3520 = sst [smem:[#allocation14_spill]] %s2563_s9  ;;  %s1978_s13 = sadd.s32 4294967294, %s2575_s0  }
   0xa   : > { %3521 = sst [smem:[#allocation15_spill]] %s2567_s10  ;;  %s33_s14 = sadd.s32 1, %s2563_s9 }
   0xb   : > { %3522 = sst [smem:[#allocation16_spill]] %s2571_s11  ;;  %p34_p0 = scmp.ge.s32.totalorder %s33_s14, 2 }
   0xc   : > { %s36_s15 = sadd.s32 1, %s2567_s10  ;;  %s40_s16 = sadd.s32 1, %s2571_s11 }
   0xd   : > { %p220_p1 = scmp.ne.s32.totalorder %s2547_s28, %s2543_s27  ;;  %s3595_s14 = smov (%p34_p0, %s33_s14), 0 }
   0xe   : > { %3523 = sst [smem:[#allocation17_spill]] %s3595_s14  ;;  %s3597_s15 = smov (!%p34_p0, %s36_s15), %s2567_s10 }
   0xf   : > { %p221_p2 = scmp.eq.s32.totalorder %s1977_s12, 7  ;;  %p226_p3 = scmp.ne.s32.totalorder %s2543_s27, %s2539_s26 }
  0x10   : > { %p38_p4 = scmp.ge.s32.totalorder %s3597_s15, 2  ;;  %p227_p5 = scmp.eq.s32.totalorder %s1978_s13, 7 }
  0x11   : > { %p2693_p6 = por %p221_p2, %p220_p1  ;;  %p1981_p8 = scmp.ge.s32.totalorder %s2575_s0, 1 }
  0x12   : > { %s3599_s15 = smov (%p38_p4, %s3597_s15), 0  ;;  %s3601_s16 = smov (!%p38_p4, %s40_s16), %s2571_s11 }
  0x13   : > { %3525 = sst [smem:[#allocation18_spill]] %s3599_s15  ;;  %p2700_p7 = por %p227_p5, %p226_p3 }
  0x14   : > { %p42_p9 = scmp.ge.s32.totalorder %s3601_s16, 2  ;;  %p282_p10 = scmp.lt.s32.totalorder %s2575_s0, 9 }
  0x15   : > { %s206_s19 = ssub.s32 %s2567_s10, %s3599_s15  ;;  %s210_s22 = sadd.s32 1, %s2547_s28 }
  0x16   : > { %s3603_s16 = smov (%p42_p9, %s3601_s16), 0  ;;  %p283_p11 = pnand %p1981_p8, %p282_p10 }
  0x17   : > { %3527 = sst [smem:[#allocation19_spill]] %s3603_s16  ;;  %s205_s20 = ssub.s32 %s2571_s11, %s3603_s16 }
  0x18   : > { %s207_s21 = sor.u32 %s206_s19, %s205_s20  ;;  %286 = sbr.rel (%p283_p11) target bundleno = 2225 (0x8b1), region = 48 }
  0x19   : > { %p208_p12 = scmp.eq.s32.totalorder %s207_s21, 0 }
  0x1b   : > { %s2714_s23 = scalar_select %p208_p12, %s2547_s28, %s210_s22  }
  0x1d   : > { %3528 = sst [smem:[#allocation20_spill]] %s2714_s23 }
  0x1f   : > { %s3514_s24 = sand.u32 1, %s2543_s27   ;;  %p325_p13 = scmp.lt.s32.totalorder %s2559_s8, 1 }
  0x20   : > { %s2720_s25 = sshll.u32 %s3514_s24, 2  ;;  %p327_p0 = scmp.lt.s32.totalorder %s2555_s30, 1 }
  0x21   : > { %s326_s12 = scalar_select %p325_p13, %s2559_s8, 1 }
  0x22   : > { %s328_s13 = scalar_select %p327_p0, %s2555_s30, 1 }
  0x23   : > { %s1983_s19 = sshll.u32 %s326_s12, 1  ;;  %p335_p1 = scmp.lt.s32.totalorder %s2551_s29, 1 }
  0x24   : > { %s330_s20 = sadd.s32 %s1983_s19, %s328_s13  ;;  %s324_s28 = scalar_lea.vmem [#allocation10], %s2720_s25 }
  0x25   : > { %s1984_s21 = sshll.u32 %s330_s20, 2  ;;  %p1987_p2 = scmp.ne.s32.totalorder %s2551_s29, 0 }
  0x26   : > { %s2729_s15 = scalar_lea.vmem %s3502_s1, %s1984_s21  ;;  %vm633_vm0 = vcmask (!%p1987_p2), 7168   ;;  %vm682_vm1 = vcmask (!%p1987_p2), 0   ;;  %v2577_v1 = vmov (!%p1987_p2), 0.0   ;;  %v2578_v2 = vmov (!%p1987_p2), -inf   ;;  %v349_v4 = vld [vmem:[%s3505_s4] sm:$0xff] (!%p1987_p2) }
  0x27   : > { %s336_s14 = scalar_select %p335_p1, %s2551_s29, 1 }
  0x28   : > { %345 = sbr.rel (%p1987_p2) target bundleno = 499 (0x1f3), region = 52  ;;  %v346_v0 = vld [vmem:[%s2729_s15] sm:$0xf] (!%p1987_p2)  ;;  %2114 = vmatprep.subr.bf16.mxu0 (!%p1987_p2), %v2577_v1  ;;  %634 = vst.msk [vmem:[#allocation3] sm:$0xff] (!%p1987_p2), %vm633_vm0, %v2578_v2  ;;  %635 = vst.msk [vmem:[#allocation3 + $0x8] sm:$0xff] (!%p1987_p2), %vm633_vm0, %v2578_v2  ;;  %vm359_vm2 = vcmask (!%p1987_p2), 1041408   ;;  %v404_v8 = vlaneseq (!%p1987_p2) }
  0x29   : > { %s338_s11 = sadd.s32 %s1983_s19, %s336_s14  ;;  %636 = vst.msk [vmem:[#allocation3 + $0x10] sm:$0xff] (!%p1987_p2), %vm633_vm0, %v2578_v2  ;;  %637 = vst.msk [vmem:[#allocation3 + $0x18] sm:$0xff] (!%p1987_p2), %vm633_vm0, %v2578_v2  ;;  %v347_v3 = vpack.c.bf16 (!%p1987_p2), %v346_v0, %v346_v0  ;;  %vm2579_vm3 = vmmov (!%p1987_p2), 0   ;;  %v2580_v6 = vmov (!%p1987_p2), 0   ;;  %v348_v7 = vld [vmem:[%s3504_s3] sm:$0xf] (!%p1987_p2) }
  0x2a   : > { %s1986_s10 = sshll.u32 %s338_s11, 2  ;;  %638 = vst.msk [vmem:[#allocation3 + $0x20] sm:$0xff] (!%p1987_p2), %vm633_vm0, %v2578_v2  ;;  %639 = vst.msk [vmem:[#allocation3 + $0x28] sm:$0xff] (!%p1987_p2), %vm633_vm0, %v2578_v2  ;;  %2116 = vmatprep.mubr.msk.bf16.mxu0 (!%p1987_p2), %vm2579_vm3, %v2577_v1  ;;  %2356 = vset.pattern.permute.xlu0 (!%p1987_p2), %v2580_v6  ;;  %vm355_vm4 = vcmask (!%p1987_p2), 31744   ;;  %v405_v9 = vshrl.u32 (!%p1987_p2), %v404_v8, 7  ;;  %v422_v11 = vand.u32 (!%p1987_p2), 127, %v404_v8 }
  0x2b   : > { %s2735_s24 = scalar_lea.vmem %s3503_s2, %s1986_s10  ;;  %640 = vst.msk [vmem:[#allocation3 + $0x30] sm:$0xff] (!%p1987_p2), %vm633_vm0, %v2578_v2  ;;  %641 = vst.msk [vmem:[#allocation3 + $0x38] sm:$0xff] (!%p1987_p2), %vm633_vm0, %v2578_v2  ;;  %v361_v5 = vsel (!%p1987_p2), %vm359_vm2, %v347_v3, 0  ;;  %352 = vperm.xlu0 (!%p1987_p2), %2356, %v349_v4   ;;  %v2581_v13 = vmov (!%p1987_p2), 1.0  }
  0x2c   : > { %642 = vst.msk [vmem:[#allocation3 + $0x40] sm:$0xff] (!%p1987_p2), %vm633_vm0, %v2578_v2  ;;  %643 = vst.msk [vmem:[#allocation3 + $0x48] sm:$0xff] (!%p1987_p2), %vm633_vm0, %v2578_v2  ;;  %2115 = vmatpush3.bf16.msra.mxu0 (!%p1987_p2), %v361_v5  ;;  %v411_v10 = vadd.s32 (!%p1987_p2), 48, %v405_v9  ;;  %v412_v12 = vadd.s32 (!%p1987_p2), 56, %v405_v9  ;;  %v413_v14 = vadd.s32 (!%p1987_p2), 64, %v405_v9  ;;  %v414_v15 = vadd.s32 (!%p1987_p2), 72, %v405_v9 }
  0x2d   : > { %644 = vst.msk [vmem:[#allocation3 + $0x50] sm:$0xff] (!%p1987_p2), %vm633_vm0, %v2578_v2  ;;  %645 = vst.msk [vmem:[#allocation3 + $0x58] sm:$0xff] (!%p1987_p2), %vm633_vm0, %v2578_v2  ;;  %vm423_vm9 = vcmp.eq.s32.totalorder (!%p1987_p2), %v405_v9, %v422_v11  ;;  %v406_v16 = vadd.s32 (!%p1987_p2), 8, %v405_v9  ;;  %v415_v17 = vadd.s32 (!%p1987_p2), 80, %v405_v9  ;;  %v416_v18 = vadd.s32 (!%p1987_p2), 88, %v405_v9 }
  0x2e   : > { %646 = vst.msk [vmem:[#allocation3 + $0x60] sm:$0xff] (!%p1987_p2), %vm633_vm0, %v2578_v2  ;;  %647 = vst.msk [vmem:[#allocation3 + $0x68] sm:$0xff] (!%p1987_p2), %vm633_vm0, %v2578_v2  ;;  %vm429_vm5 = vcmp.eq.s32.totalorder (!%p1987_p2), %v411_v10, %v422_v11  ;;  %vm430_vm6 = vcmp.eq.s32.totalorder (!%p1987_p2), %v412_v12, %v422_v11  ;;  %vm431_vm7 = vcmp.eq.s32.totalorder (!%p1987_p2), %v413_v14, %v422_v11  ;;  %v407_v19 = vadd.s32 (!%p1987_p2), 16, %v405_v9 }
  0x2f   : > { %648 = vst.msk [vmem:[#allocation3 + $0x70] sm:$0xff] %vm633_vm0, %v2578_v2  ;;  %649 = vst.msk [vmem:[#allocation3 + $0x78] sm:$0xff] %vm633_vm0, %v2578_v2  ;;  %2117 = vmatmul.mubr.msk.bf16.vlgmr.msra.gmra.mrb[0].mxu0 %vm355_vm4, %v348_v7  ;;  %2131 = vmatprep.mubr.msk.f32.mxu1 %vm429_vm5, %v2581_v13  ;;  %vm432_vm8 = vcmp.eq.s32.totalorder %v414_v15, %v422_v11  ;;  %vm424_vm10 = vcmp.eq.s32.totalorder %v406_v16, %v422_v11  ;;  %v408_v20 = vadd.s32 24, %v405_v9  ;;  %vm624_vm5 = vcmask 64512  }
  0x30   : > { %650 = vst.msk [vmem:[#allocation4] sm:$0xff] %vm633_vm0, %v2577_v1  ;;  %651 = vst.msk [vmem:[#allocation4 + $0x8] sm:$0xff] %vm633_vm0, %v2577_v1  ;;  %2122 = vmatprep.mubr.msk.f32.mxu0 %vm423_vm9, %v2581_v13  ;;  %vm433_vm11 = vcmp.eq.s32.totalorder %v415_v17, %v422_v11  ;;  %vm434_vm12 = vcmp.eq.s32.totalorder %v416_v18, %v422_v11  ;;  %v417_v21 = vadd.s32 96, %v405_v9  ;;  %v418_v22 = vadd.s32 104, %v405_v9 }
  0x31   : > { %652 = vst.msk [vmem:[#allocation4 + $0x10] sm:$0xff] %vm633_vm0, %v2577_v1  ;;  %653 = vst.msk [vmem:[#allocation4 + $0x18] sm:$0xff] %vm633_vm0, %v2577_v1  ;;  %vm425_vm13 = vcmp.eq.s32.totalorder %v407_v19, %v422_v11  ;;  %vm426_vm14 = vcmp.eq.s32.totalorder %v408_v20, %v422_v11  ;;  %v409_v23 = vadd.s32 32, %v405_v9  ;;  %v410_v24 = vadd.s32 40, %v405_v9 }
  0x32   : > { %654 = vst.msk [vmem:[#allocation4 + $0x20] sm:$0xff] %vm633_vm0, %v2577_v1  ;;  %655 = vst.msk [vmem:[#allocation4 + $0x28] sm:$0xff] %vm633_vm0, %v2577_v1  ;;  %vm435_vm15 = vcmp.eq.s32.totalorder %v417_v21, %v422_v11  ;;  %v419_v25 = vadd.s32 112, %v405_v9  ;;  %v420_v26 = vadd.s32 120, %v405_v9 }
  0x33   : > { %656 = vst.msk [vmem:[#allocation4 + $0x30] sm:$0xff] %vm633_vm0, %v2577_v1  ;;  %657 = vst.msk [vmem:[#allocation4 + $0x38] sm:$0xff] %vm633_vm0, %v2577_v1  ;;  %vm428_vm2 = vcmp.eq.s32.totalorder %v410_v24, %v422_v11 }
  0x34   : > { %658 = vst.msk [vmem:[#allocation4 + $0x40] sm:$0xff] %vm633_vm0, %v2577_v1  ;;  %659 = vst.msk [vmem:[#allocation4 + $0x48] sm:$0xff] %vm633_vm0, %v2577_v1  ;;  %vm437_vm3 = vcmp.eq.s32.totalorder %v419_v25, %v422_v11  ;;  %vm438_vm4 = vcmp.eq.s32.totalorder %v420_v26, %v422_v11 }
  0x35   : > { %660 = vst.msk [vmem:[#allocation4 + $0x50] sm:$0xff] %vm633_vm0, %v2577_v1  ;;  %661 = vst.msk [vmem:[#allocation4 + $0x58] sm:$0xff] %vm633_vm0, %v2577_v1 }
  0x36   : > { %662 = vst.msk [vmem:[#allocation4 + $0x60] sm:$0xff] %vm633_vm0, %v2577_v1  ;;  %663 = vst.msk [vmem:[#allocation4 + $0x68] sm:$0xff] %vm633_vm0, %v2577_v1 }
  0x37   : > { %664 = vst.msk [vmem:[#allocation4 + $0x70] sm:$0xff] %vm633_vm0, %v2577_v1  ;;  %665 = vst.msk [vmem:[#allocation4 + $0x78] sm:$0xff] %vm633_vm0, %v2577_v1 }
  0x38   : > { %683 = vst.msk [vmem:[#allocation6] sm:$0x1] %vm682_vm1, %v2578_v2  ;;  %684 = vst.msk [vmem:[#allocation7] sm:$0x1] %vm682_vm1, %v2577_v1  ;;  %vm427_vm1 = vcmp.eq.s32.totalorder %v409_v23, %v422_v11 }
  0x39   : > { %685 = vst.msk [vmem:[#allocation8] sm:$0xff] %vm633_vm0, %v2577_v1  ;;  %vm436_vm0 = vcmp.eq.s32.totalorder %v418_v22, %v422_v11 }
  0x3a   : > { %666 = vst.msk [vmem:[#allocation5] sm:$0xff] %vm624_vm5, %v2577_v1  ;;  %667 = vst.msk [vmem:[#allocation5 + $0x8] sm:$0xff] %vm624_vm5, %v2577_v1 }
  0x3b   : > { %668 = vst.msk [vmem:[#allocation5 + $0x10] sm:$0xff] %vm624_vm5, %v2577_v1  ;;  %669 = vst.msk [vmem:[#allocation5 + $0x18] sm:$0xff] %vm624_vm5, %v2577_v1 }
  0x3c   : > { %670 = vst.msk [vmem:[#allocation5 + $0x20] sm:$0xff] %vm624_vm5, %v2577_v1  ;;  %671 = vst.msk [vmem:[#allocation5 + $0x28] sm:$0xff] %vm624_vm5, %v2577_v1 }
  0x3d   : > { %672 = vst.msk [vmem:[#allocation5 + $0x30] sm:$0xff] %vm624_vm5, %v2577_v1  ;;  %673 = vst.msk [vmem:[#allocation5 + $0x38] sm:$0xff] %vm624_vm5, %v2577_v1 }
  0x3e   : > { %674 = vst.msk [vmem:[#allocation5 + $0x40] sm:$0xff] %vm624_vm5, %v2577_v1  ;;  %675 = vst.msk [vmem:[#allocation5 + $0x48] sm:$0xff] %vm624_vm5, %v2577_v1 }
  0x3f   : > { %676 = vst.msk [vmem:[#allocation5 + $0x50] sm:$0xff] %vm624_vm5, %v2577_v1  ;;  %677 = vst.msk [vmem:[#allocation5 + $0x58] sm:$0xff] %vm624_vm5, %v2577_v1 }
  0x40   : > { %678 = vst.msk [vmem:[#allocation5 + $0x60] sm:$0xff] %vm624_vm5, %v2577_v1  ;;  %679 = vst.msk [vmem:[#allocation5 + $0x68] sm:$0xff] %vm624_vm5, %v2577_v1 }
  0x41   : > { %680 = vst.msk [vmem:[#allocation5 + $0x70] sm:$0xff] %vm624_vm5, %v2577_v1  ;;  %681 = vst.msk [vmem:[#allocation5 + $0x78] sm:$0xff] %vm624_vm5, %v2577_v1 }
  0xaa   : > { %v353_v27 = vpop.permute.xlu0 %352 }
 0x102   : > { %v397_v28 = vpop.f32.mrb[0].mxu0 }
 0x103   : > { %v398_v29 = vadd.f32 %v397_v28, %v353_v27  ;;  %v2118_v30 = vpop.f32.mrb[1].mxu0 }
 0x104   : > { %v400_v31 = vpop.f32.mrb[2].mxu0 }
 0x105   : > { %v403_v32 = vmul.f32 0.70710677, %v398_v29  ;;  %v2119_v33 = vpop.f32.mrb[3].mxu0 }
 0x107   : > { %2120 = vmatprep.subr.mxu0 %v403_v32  ;;  %2255 = vmatprep.subr.mxu1 %v403_v32 }
 0x108   : > { %2121 = vmatpush3.xpose.msra.mxu0 %v403_v32  ;;  %2256 = vmatpush3.xpose.msra.mxu1 %v403_v32 }
 0x10b   : > { %2132 = vmatmul.mubr.msk.f32.vlgmr.msra.gmra.mrb[0].mxu1 %vm430_vm6, %v2581_v13  ;;  %2123 = vmatmul.mubr.msk.f32.vlgmr.msra.gmra.mrb[4].mxu0 %vm424_vm10, %v2581_v13 }
 0x10c   : > { %2134 = vmatprep.mubr.msk.f32.mxu1 %vm431_vm7, %v2581_v13  ;;  %2125 = vmatprep.mubr.msk.f32.mxu0 %vm425_vm13, %v2581_v13 }
 0x10f   : > { %2135 = vmatmul.mubr.msk.f32.gmra.mrb[2].mxu1 %vm432_vm8, %v2581_v13  ;;  %2126 = vmatmul.mubr.msk.f32.gmra.mrb[6].mxu0 %vm426_vm14, %v2581_v13 }
 0x110   : > { %2137 = vmatprep.mubr.msk.f32.mxu1 %vm433_vm11, %v2581_v13  ;;  %2128 = vmatprep.mubr.msk.f32.mxu0 %vm427_vm1, %v2581_v13 }
 0x113   : > { %2138 = vmatmul.mubr.msk.f32.gmra.mrb[4].mxu1 %vm434_vm12, %v2581_v13  ;;  %2129 = vmatmul.mubr.msk.f32.gmra.mrb[8].mxu0 %vm428_vm2, %v2581_v13 }
 0x114   : > { %2140 = vmatprep.mubr.msk.f32.mxu1 %vm435_vm15, %v2581_v13 }
 0x117   : > { %2141 = vmatmul.mubr.msk.f32.gmra.mrb[6].mxu1 %vm436_vm0, %v2581_v13 }
 0x118   : > { %2143 = vmatprep.mubr.msk.f32.mxu1 %vm437_vm3, %v2581_v13 }
 0x11b   : > { %2144 = vmatmul.mubr.msk.f32.gmra.mrb[8].mxu1 %vm438_vm4, %v2581_v13 }
 0x1de   : > { %v2133_v34 = vpop.f32.mrb[0].mxu1  ;;  %v2124_v35 = vpop.f32.mrb[4].mxu0 }
 0x1df   : > { %v567_v36 = vpop.f32.mrb[1].mxu1  ;;  %v537_v37 = vpop.f32.mrb[5].mxu0 }
 0x1e0   : > { %v619_v38 = vpack.c.bf16 %v2133_v34, %v567_v36  ;;  %v616_v39 = vpack.c.bf16 %v2124_v35, %v537_v37 }
 0x1e2   : > { %628 = vst.msk [vmem:[#allocation2 + $0x18] sm:$0xff] %vm624_vm5, %v619_v38  ;;  %v2136_v40 = vpop.f32.mrb[2].mxu1  ;;  %625 = vst.msk [vmem:[#allocation2] sm:$0xff] %vm624_vm5, %v616_v39  ;;  %v2127_v41 = vpop.f32.mrb[6].mxu0 }
 0x1e3   : > { %v577_v42 = vpop.f32.mrb[3].mxu1  ;;  %v547_v43 = vpop.f32.mrb[7].mxu0 }
 0x1e4   : > { %v620_v44 = vpack.c.bf16 %v2136_v40, %v577_v42  ;;  %v617_v45 = vpack.c.bf16 %v2127_v41, %v547_v43 }
 0x1e6   : > { %629 = vst.msk [vmem:[#allocation2 + $0x20] sm:$0xff] %vm624_vm5, %v620_v44  ;;  %v2139_v46 = vpop.f32.mrb[4].mxu1  ;;  %626 = vst.msk [vmem:[#allocation2 + $0x8] sm:$0xff] %vm624_vm5, %v617_v45  ;;  %v2130_v47 = vpop.f32.mrb[8].mxu0 }
 0x1e7   : > { %v587_v48 = vpop.f32.mrb[5].mxu1  ;;  %v557_v49 = vpop.f32.mrb[9].mxu0 }
 0x1e8   : > { %v621_v50 = vpack.c.bf16 %v2139_v46, %v587_v48  ;;  %v618_v51 = vpack.c.bf16 %v2130_v47, %v557_v49 }
 0x1ea   : > { %630 = vst.msk [vmem:[#allocation2 + $0x28] sm:$0xff] %vm624_vm5, %v621_v50  ;;  %v2142_v52 = vpop.f32.mrb[6].mxu1  ;;  %627 = vst.msk [vmem:[#allocation2 + $0x10] sm:$0xff] %vm624_vm5, %v618_v51 }
 0x1eb   : > { %v597_v53 = vpop.f32.mrb[7].mxu1 }
 0x1ec   : > { %v622_v54 = vpack.c.bf16 %v2142_v52, %v597_v53 }
 0x1ee   : > { %631 = vst.msk [vmem:[#allocation2 + $0x30] sm:$0xff] %vm624_vm5, %v622_v54  ;;  %v2145_v55 = vpop.f32.mrb[8].mxu1 }
 0x1ef   : > { %v607_v56 = vpop.f32.mrb[9].mxu1 }
 0x1f0   : > { %v623_v57 = vpack.c.bf16 %v2145_v55, %v607_v56 }
 0x1f2   : > { %632 = vst.msk [vmem:[#allocation2 + $0x38] sm:$0xff] %vm624_vm5, %v623_v57 }
 0x1f3 PF: > { %v686_v58 = vld [vmem:[%s2735_s24] sm:$0xf]  ;;  %vm724_vm6 = vcmask 1041408   ;;  %vm717_vm7 = vcmask 31744   ;;  %v2582_v61 = vmov 0   ;;  %vm785_vm8 = vcmask 64512  }
 0x1f4   : > { %v2359_v59 = vld [vmem:[%s3506_s5] sm:$0xff]   ;;  %v687_v60 = vpack.c.bf16 %v686_v58, %v686_v58  ;;  %2357 = vset.pattern.permute.xlu0 %v2582_v61  ;;  %v2360_v0 = vld [vmem:[%s3506_s5 + $0x8] ss:$0 sps:$4 sm:$0xff]   ;;  %2358 = vset.pattern.permute.xlu1 %v2582_v61  ;;  %vm810_vm9 = vcmask 1043456   ;;  %v778_v11 = vld [vmem:[#allocation2 + $0x10] sm:$0xff]  ;;  %vm1231_vm10 = vcmask 7168  }
 0x1f5   : > { %2148 = vmatprep.mubr.msk.bf16.mxu0 %vm717_vm7, %v2359_v59  ;;  %v691_v62 = vld [vmem:[%s3507_s6] sm:$0xff]  ;;  %v777_v10 = vld [vmem:[#allocation2 + $0x8] sm:$0xff]  ;;  %v779_v12 = vld [vmem:[#allocation2 + $0x18] sm:$0xff]  ;;  %vm1515_vm11 = vcmask 1040384   ;;  %vm1541_vm12 = vcmask 0   ;;  %p2033_p3 = scmp.ne.s32.totalorder %s2551_s29, 1 }
 0x1f6   : > { %2257 = vmatprep.subr.msk.bf16.mxu0 %vm724_vm6, %v687_v60  ;;  %v726_v63 = vsel %vm724_vm6, %v687_v60, 0  ;;  %696 = vperm.xlu0 %2357, %v691_v62   ;;  %v776_v1 = vld [vmem:[#allocation2] sm:$0xff]  ;;  %v781_v14 = vld [vmem:[#allocation2 + $0x28] sm:$0xff]  ;;  %v782_v15 = vld [vmem:[#allocation2 + $0x30] sm:$0xff]  ;;  %vm2585_vm13 = vmmov (!%p2033_p3), 0   ;;  %s1848_s29 = sld [smem:[#allocation9]] (!%p2033_p3) }
 0x1f7   : > { %2147 = vmatpush3.bf16.msra.mxu0 %v726_v63  ;;  %2154 = vmatprep.mubr.msk.bf16.mxu1 %vm785_vm8, %v776_v1  ;;  %v780_v13 = vld [vmem:[#allocation2 + $0x20] sm:$0xff]  ;;  %v2925_v33 = vld [vmem:[#allocation3 + $0x10] sm:$0xff]  ;;  %v2935_v39 = vld [vmem:[#allocation3 + $0x18] sm:$0xff] }
 0x1f8   : > { %v2927_v34 = vld [vmem:[#allocation3] sm:$0xff]  ;;  %v2950_v44 = vld [vmem:[#allocation3 + $0x8] sm:$0xff]  ;;  %v2960_v48 = vld [vmem:[#allocation3 + $0x30] sm:$0xff] }
 0x1f9   : > { %v783_v16 = vld [vmem:[#allocation2 + $0x38] sm:$0xff]  ;;  %v692_v51 = vld [vmem:[%s3507_s6 + $0x8] sm:$0xff]  ;;  %v2973_v53 = vld [vmem:[#allocation3 + $0x20] sm:$0xff] }
 0x1fa   : > { %2149 = vmatmul.mubr.msk.bf16.vlgmr.msra.gmra.mrb[0].mxu0 %vm717_vm7, %v2360_v0  ;;  %v2975_v54 = vld [vmem:[#allocation3 + $0x50] sm:$0xff]  ;;  %v2988_v60 = vld [vmem:[#allocation3 + $0x38] sm:$0xff]  ;;  %v3002_v1 = vld [vmem:[#allocation3 + $0x28] sm:$0xff] }
 0x1fb   : > { %vm3406_vm14 = vmpackc.low (!%p2033_p3), %vm785_vm8, %vm785_vm8 }
 0x275   : > { %v697_v2 = vpop.permute.xlu0 %696 }
 0x2cd   : > { %v2866_v3 = vpop.f32.mrb[0].mxu0 }
 0x2ce   : > { %v762_v4 = vpop.f32.mrb[1].mxu0 }
 0x2cf   : > { %v763_v5 = vadd.f32 %v762_v4, %v697_v2  ;;  %v2151_v6 = vpop.f32.mrb[2].mxu0  ;;  %v3009_v4 = vld [vmem:[#allocation3 + $0x60] sm:$0xff] }
 0x2d0   : > { %v2868_v7 = vpop.f32.mrb[3].mxu0 }
 0x2d1   : > { %v784_v8 = vpack.c.bf16 %v763_v5, %v763_v5 }
 0x2d3   : > { %2258 = vmatprep.subr.msk.bf16.mxu1 %vm810_vm9, %v784_v8  ;;  %v812_v9 = vsel %vm810_vm9, %v784_v8, 0 }
 0x2d4   : > { %2153 = vmatpush3.bf16.msra.mxu1 %v812_v9  ;;  %v3014_v9 = vld [vmem:[#allocation3 + $0x40] sm:$0xff] }
 0x2d7   : > { %2155 = vmatmul.mubr.msk.bf16.vlgmr.msra.gmra.mrb[0].mxu1 %vm785_vm8, %v777_v10 }
 0x2d8   : > { %2158 = vmatprep.mubr.msk.bf16.mxu1 %vm785_vm8, %v778_v11 }
 0x2df   : > { %2159 = vmatmul.mubr.msk.bf16.gmra.mrb[4].mxu1 %vm785_vm8, %v779_v12  ;;  %v3024_v12 = vld [vmem:[#allocation3 + $0x70] sm:$0xff] }
 0x2e0   : > { %2162 = vmatprep.mubr.msk.bf16.mxu1 %vm785_vm8, %v780_v13 }
 0x2e7   : > { %2163 = vmatmul.mubr.msk.bf16.gmra.mrb[8].mxu1 %vm785_vm8, %v781_v14 }
 0x2e8   : > { %2166 = vmatprep.mubr.msk.bf16.mxu1 %vm785_vm8, %v782_v15 }
 0x2ef   : > { %2167 = vmatmul.mubr.msk.bf16.gmra.mrb[12].mxu1 %vm785_vm8, %v783_v16 }
 0x3aa   : > { %v2877_v17 = vpop.f32.mrb[0].mxu1 }
 0x3ab   : > { %931 = vmax.xlane.f32.xlu1 %v2877_v17  ;;  %v2880_v18 = vpop.f32.mrb[1].mxu1 }
 0x3ac   : > { %927 = vmax.xlane.f32.xlu0 %v2880_v18  ;;  %v2883_v19 = vpop.f32.mrb[2].mxu1 }
 0x3ad   : > { %v2885_v20 = vpop.f32.mrb[3].mxu1 }
 0x3af   : > { %933 = vmax.xlane.f32.xlu1 %v2883_v19 }
 0x3b2   : > { %v2888_v21 = vpop.f32.mrb[4].mxu1 }
 0x3b3   : > { %929 = vmax.xlane.f32.xlu1 %v2885_v20  ;;  %v2891_v22 = vpop.f32.mrb[5].mxu1 }
 0x3b4   : > { %v2893_v23 = vpop.f32.mrb[6].mxu1 }
 0x3b5   : > { %v2895_v24 = vpop.f32.mrb[7].mxu1 }
 0x3b7   : > { %939 = vmax.xlane.f32.xlu1 %v2888_v21 }
 0x3ba   : > { %v2898_v25 = vpop.f32.mrb[8].mxu1 }
 0x3bb   : > { %935 = vmax.xlane.f32.xlu1 %v2891_v22  ;;  %947 = vmax.xlane.f32.xlu0 %v2898_v25  ;;  %v2902_v26 = vpop.f32.mrb[9].mxu1 }
 0x3bc   : > { %v2904_v27 = vpop.f32.mrb[10].mxu1 }
 0x3bd   : > { %v2906_v28 = vpop.f32.mrb[11].mxu1 }
 0x3bf   : > { %941 = vmax.xlane.f32.xlu1 %v2893_v23 }
 0x3c2   : > { %v2909_v29 = vpop.f32.mrb[12].mxu1 }
 0x3c3   : > { %937 = vmax.xlane.f32.xlu1 %v2895_v24  ;;  %v2912_v30 = vpop.f32.mrb[13].mxu1 }
 0x3c4   : > { %v2914_v31 = vpop.f32.mrb[14].mxu1  ;;  %951 = vmax.xlane.f32.xlu0 %v2912_v30 }
 0x3c5   : > { %v2917_v32 = vpop.f32.mrb[15].mxu1 }
 0x3c7   : > { %943 = vmax.xlane.f32.xlu1 %v2902_v26 }
 0x3c8   : > { %955 = vmax.xlane.f32.xlu0 %v2909_v29 }
 0x3cb   : > { %945 = vmax.xlane.f32.xlu1 %v2906_v28 }
 0x3cf   : > { %949 = vmax.xlane.f32.xlu1 %v2904_v27 }
 0x3d3   : > { %953 = vmax.xlane.f32.xlu1 %v2917_v32 }
 0x3d7   : > { %957 = vmax.xlane.f32.xlu1 %v2914_v31 }
 0x438   : > { %v932_v35 = vpop.xlane.xlu1 %931 }
 0x439   : > { %v2930_v36 = vmax.f32 %v2925_v33, %v932_v35  ;;  %v928_v37 = vpop.xlane.xlu0 %927  ;;  %v3033_v35 = vld [vmem:[#allocation3 + $0x48] sm:$0xff] }
 0x43a   : > { %v2933_v38 = vmax.f32 %v2927_v34, %v928_v37 }
 0x43b   : > { %1500 = vst.msk [vmem:[#allocation3 + $0x10] sm:$0xff] %vm1231_vm10, %v2930_v36  ;;  %1035 = vperm.xlu1 %2358, %v2930_v36  }
 0x43c   : > { %1498 = vst.msk [vmem:[#allocation3] sm:$0xff] %vm1231_vm10, %v2933_v38  ;;  %v934_v42 = vpop.xlane.xlu1 %933  ;;  %1025 = vperm.xlu0 %2357, %v2933_v38  }
 0x43d   : > { %v2948_v43 = vmax.f32 %v2935_v39, %v934_v42 }
 0x43f   : > { %1501 = vst.msk [vmem:[#allocation3 + $0x18] sm:$0xff] %vm1231_vm10, %v2948_v43 }
 0x440   : > { %v930_v46 = vpop.xlane.xlu1 %929  ;;  %1040 = vperm.xlu0 %2357, %v2948_v43  }
 0x441   : > { %v2958_v47 = vmax.f32 %v2950_v44, %v930_v46 }
 0x443   : > { %1499 = vst.msk [vmem:[#allocation3 + $0x8] sm:$0xff] %vm1231_vm10, %v2958_v47  ;;  %1030 = vperm.xlu1 %2358, %v2958_v47  }
 0x444   : > { %v940_v50 = vpop.xlane.xlu1 %939 }
 0x445   : > { %v2971_v52 = vmax.f32 %v2960_v48, %v940_v50  ;;  %v693_v50 = vld [vmem:[%s3507_s6 + $0x10] sm:$0xff] }
 0x447   : > { %1504 = vst.msk [vmem:[#allocation3 + $0x30] sm:$0xff] %vm1231_vm10, %v2971_v52  ;;  %1055 = vperm.xlu0 %2357, %v2971_v52   ;;  %701 = vperm.xlu1 %2358, %v692_v51  }
 0x448   : > { %v936_v56 = vpop.xlane.xlu1 %935  ;;  %v948_v57 = vpop.xlane.xlu0 %947 }
 0x449   : > { %v2983_v58 = vmax.f32 %v2973_v53, %v936_v56  ;;  %v2986_v59 = vmax.f32 %v2975_v54, %v948_v57  ;;  %v3054_v57 = vld [vmem:[#allocation3 + $0x58] sm:$0xff] }
 0x44b   : > { %1502 = vst.msk [vmem:[#allocation3 + $0x20] sm:$0xff] %vm1231_vm10, %v2983_v58  ;;  %1045 = vperm.xlu0 %2357, %v2983_v58   ;;  %1508 = vst.msk [vmem:[#allocation3 + $0x50] sm:$0xff] %vm1231_vm10, %v2986_v59 }
 0x44c   : > { %v942_v63 = vpop.xlane.xlu1 %941 }
 0x44d   : > { %v3000_v0 = vmax.f32 %v2988_v60, %v942_v63 }
 0x44f   : > { %1505 = vst.msk [vmem:[#allocation3 + $0x38] sm:$0xff] %vm1231_vm10, %v3000_v0  ;;  %1075 = vperm.xlu0 %2357, %v2986_v59  }
 0x450   : > { %v938_v5 = vpop.xlane.xlu1 %937 }
 0x451   : > { %v3012_v6 = vmax.f32 %v3002_v1, %v938_v5  ;;  %v952_v8 = vpop.xlane.xlu0 %951 }
 0x452   : > { %v3017_v10 = vmax.f32 %v3009_v4, %v952_v8 }
 0x453   : > { %1503 = vst.msk [vmem:[#allocation3 + $0x28] sm:$0xff] %vm1231_vm10, %v3012_v6  ;;  %1050 = vperm.xlu1 %2358, %v3012_v6  }
 0x454   : > { %v944_v13 = vpop.xlane.xlu1 %943  ;;  %1510 = vst.msk [vmem:[#allocation3 + $0x60] sm:$0xff] %vm1231_vm10, %v3017_v10 }
 0x455   : > { %v3031_v15 = vmax.f32 %v3014_v9, %v944_v13  ;;  %v956_v16 = vpop.xlane.xlu0 %955  ;;  %v3064_v13 = vld [vmem:[#allocation3 + $0x68] sm:$0xff] }
 0x456   : > { %v3036_v37 = vmax.f32 %v3024_v12, %v956_v16 }
 0x457   : > { %1506 = vst.msk [vmem:[#allocation3 + $0x40] sm:$0xff] %vm1231_vm10, %v3031_v15  ;;  %1065 = vperm.xlu0 %2357, %v3031_v15   ;;  %1060 = vperm.xlu1 %2358, %v3000_v0  }
 0x458   : > { %3529 = vst [vmem:[#allocation21_spill] sm:$0xff] %v3036_v37  ;;  %v946_v46 = vpop.xlane.xlu1 %945  ;;  %1512 = vst.msk [vmem:[#allocation3 + $0x70] sm:$0xff] %vm1231_vm10, %v3036_v37 }
 0x459   : > { %v3052_v56 = vmax.f32 %v3033_v35, %v946_v46 }
 0x45b   : > { %1507 = vst.msk [vmem:[#allocation3 + $0x48] sm:$0xff] %vm1231_vm10, %v3052_v56  ;;  %706 = vperm.xlu0 %2357, %v693_v50   ;;  %1070 = vperm.xlu1 %2358, %v3052_v56   ;;  %v3074_v50 = vld [vmem:[#allocation3 + $0x78] sm:$0xff] }
 0x45c   : > { %v950_v5 = vpop.xlane.xlu1 %949 }
 0x45d   : > { %v3062_v8 = vmax.f32 %v3054_v57, %v950_v5 }
 0x45f   : > { %1509 = vst.msk [vmem:[#allocation3 + $0x58] sm:$0xff] %vm1231_vm10, %v3062_v8  ;;  %1080 = vperm.xlu1 %2358, %v3062_v8  }
 0x460   : > { %v954_v46 = vpop.xlane.xlu1 %953 }
 0x461   : > { %v3072_v51 = vmax.f32 %v3064_v13, %v954_v46 }
 0x463   : > { %1511 = vst.msk [vmem:[#allocation3 + $0x68] sm:$0xff] %vm1231_vm10, %v3072_v51  ;;  %1085 = vperm.xlu1 %2358, %v3017_v10   ;;  %1090 = vperm.xlu0 %2357, %v3072_v51  }
 0x464   : > { %v958_v14 = vpop.xlane.xlu1 %957 }
 0x465   : > { %v3083_v42 = vmax.f32 %v3074_v50, %v958_v14 }
 0x467   : > { %1513 = vst.msk [vmem:[#allocation3 + $0x78] sm:$0xff] %vm1231_vm10, %v3083_v42  ;;  %1095 = vperm.xlu1 %2358, %v3036_v37   ;;  %1100 = vperm.xlu0 %2357, %v3083_v42  }
 0x4ba   : > { %v1036_v63 = vpop.permute.xlu1 %1035 }
 0x4bb   : > { %v1026_v5 = vpop.permute.xlu0 %1025  ;;  %v1105_v55 = vsub.f32 %v2877_v17, %v1036_v63 }
 0x4bc   : > { %v1103_v62 = vsub.f32 %v2880_v18, %v1026_v5 }
 0x4bd   : > { %v1123_v40 = vmul.f32 1.442695, %v1105_v55 }
 0x4be   : > { %v1119_v2 = vmul.f32 1.442695, %v1103_v62 }
 0x4bf   : > { %v1041_v16 = vpop.permute.xlu0 %1040 }
 0x4c0   : > { %v1106_v14 = vsub.f32 %v2883_v19, %v1041_v16  ;;  %2361 = vpow2.f32 %v1119_v2 }
 0x4c2   : > { %v1125_v61 = vmul.f32 1.442695, %v1106_v14  ;;  %v1031_v11 = vpop.permute.xlu1 %1030 }
 0x4c3   : > { %v1104_v46 = vsub.f32 %v2885_v20, %v1031_v11 }
 0x4c4   : > { %2363 = vpow2.f32 %v1125_v61 }
 0x4c5   : > { %v1121_v45 = vmul.f32 1.442695, %v1104_v46 }
 0x4c6   : > { %v1056_v41 = vpop.permute.xlu0 %1055  ;;  %v702_v49 = vpop.permute.xlu1 %701 }
 0x4c7   : > { %2365 = vpow2.f32 %v1121_v45  ;;  %v3096_v37 = vadd.f32 %v2868_v7, %v702_v49  ;;  %v1109_v2 = vsub.f32 %v2888_v21, %v1056_v41 }
 0x4c8   : > { %2367 = vpow2.f32 %v1123_v40 }
 0x4c9   : > { %v1368_v17 = vpack.c.bf16 %v3096_v37, %v3096_v37  ;;  %v1131_v46 = vmul.f32 1.442695, %v1109_v2 }
 0x4ca   : > { %v1046_v18 = vpop.permute.xlu0 %1045  ;;  %v3101_v20 = vpop.eup %2361 }
 0x4cb   : > { %2170 = vmatprep.subr.bf16.mxu0 %v1368_v17  ;;  %v1107_v19 = vsub.f32 %v2891_v22, %v1046_v18 }
 0x4cc   : > { %2171 = vmatpush3.bf16.xpose.msra.mxu0 %v1368_v17 }
 0x4cd   : > { %v1127_v45 = vmul.f32 1.442695, %v1107_v19 }
 0x4ce   : > { %v3103_v55 = vpop.eup %2363  ;;  %v1076_v7 = vpop.permute.xlu0 %1075 }
 0x4cf   : > { %2369 = vpow2.f32 %v1127_v45  ;;  %v1113_v21 = vsub.f32 %v2898_v25, %v1076_v7 }
 0x4d1   : > { %v3105_v61 = vpop.eup %2365  ;;  %v1139_v2 = vmul.f32 1.442695, %v1113_v21 }
 0x4d2   : > { %v3107_v62 = vpop.eup %2367  ;;  %v1051_v49 = vpop.permute.xlu1 %1050  ;;  %v1360_v40 = vpack.c.bf16 %v3105_v61, %v3101_v20 }
 0x4d3   : > { %v1108_v11 = vsub.f32 %v2895_v24, %v1051_v49  ;;  %v1361_v22 = vpack.c.bf16 %v3103_v55, %v3107_v62 }
 0x4d4   : > { %2172 = vmatprep.mubr.bf16.mxu0 %v1360_v40 }
 0x4d5   : > { %v1129_v63 = vmul.f32 1.442695, %v1108_v11  ;;  %2173 = vmatmul.mubr.bf16.vlgmr.msra.gmra.mrb[4].mxu0 %v1361_v22 }
 0x4d6   : > { %v1066_v16 = vpop.permute.xlu0 %1065  ;;  %v1061_v5 = vpop.permute.xlu1 %1060 }
 0x4d7   : > { %2371 = vpow2.f32 %v1129_v63  ;;  %v1111_v14 = vsub.f32 %v2902_v26, %v1066_v16  ;;  %v1110_v17 = vsub.f32 %v2893_v23, %v1061_v5 }
 0x4d8   : > { %2373 = vpow2.f32 %v1131_v46 }
 0x4d9   : > { %v1133_v18 = vmul.f32 1.442695, %v1110_v17  ;;  %v1135_v41 = vmul.f32 1.442695, %v1111_v14  ;;  %v3125_v7 = vpop.eup %2369 }
 0x4da   : > { %v707_v24 = vpop.permute.xlu0 %706  ;;  %v1071_v19 = vpop.permute.xlu1 %1070 }
 0x4db   : > { %v3119_v49 = vadd.f32 %v2866_v3, %v707_v24  ;;  %v1112_v45 = vsub.f32 %v2906_v28, %v1071_v19  ;;  %2375 = vpow2.f32 %v1133_v18 }
 0x4dc   : > { %2377 = vpow2.f32 %v1135_v41 }
 0x4dd   : > { %v1137_v40 = vmul.f32 1.442695, %v1112_v45  ;;  %v1516_v26 = vsel %vm1515_vm11, %v3119_v49, -inf }
 0x4de   : > { %1517 = vmax.xlane.f32.xlu1 %v1516_v26  ;;  %v1081_v23 = vpop.permute.xlu1 %1080 }
 0x4df   : > { %2379 = vpow2.f32 %v1137_v40  ;;  %v1114_v25 = vsub.f32 %v2904_v27, %v1081_v23 }
 0x4e0   : > { %2381 = vpow2.f32 %v1139_v2 }
 0x4e1   : > { %v3127_v11 = vpop.eup %2371  ;;  %v1141_v3 = vmul.f32 1.442695, %v1114_v25 }
 0x4e2   : > { %v1091_v22 = vpop.permute.xlu0 %1090  ;;  %v1086_v28 = vpop.permute.xlu1 %1085  ;;  %v1362_v63 = vpack.c.bf16 %v3127_v11, %v3125_v7 }
 0x4e3   : > { %2383 = vpow2.f32 %v1141_v3  ;;  %v1116_v16 = vsub.f32 %v2917_v32, %v1091_v22  ;;  %v1115_v5 = vsub.f32 %v2912_v30, %v1086_v28  ;;  %v3133_v46 = vpop.eup %2373 }
 0x4e4   : > { %2176 = vmatprep.mubr.bf16.mxu0 %v1362_v63 }
 0x4e5   : > { %v1145_v27 = vmul.f32 1.442695, %v1116_v16  ;;  %v1143_v14 = vmul.f32 1.442695, %v1115_v5  ;;  %v3135_v17 = vpop.eup %2375  ;;  %v3165_v16 = vld [vmem:[#allocation6] sm:$0x1] }
 0x4e6   : > { %v1101_v18 = vpop.permute.xlu0 %1100  ;;  %v1096_v21 = vpop.permute.xlu1 %1095  ;;  %v1363_v19 = vpack.c.bf16 %v3135_v17, %v3133_v46 }
 0x4e7   : > { %2385 = vpow2.f32 %v1145_v27  ;;  %v1118_v41 = vsub.f32 %v2914_v31, %v1101_v18  ;;  %v1117_v24 = vsub.f32 %v2909_v29, %v1096_v21  ;;  %v3141_v32 = vpop.eup %2377 }
 0x4e8   : > { %2387 = vpow2.f32 %v1143_v14  ;;  %2177 = vmatmul.mubr.bf16.gmra.mrb[8].mxu0 %v1363_v19 }
 0x4e9   : > { %v3143_v30 = vpop.eup %2379  ;;  %v1149_v45 = vmul.f32 1.442695, %v1118_v41  ;;  %v1147_v40 = vmul.f32 1.442695, %v1117_v24 }
 0x4ea   : > { %v1364_v26 = vpack.c.bf16 %v3143_v30, %v3141_v32  ;;  %v3147_v2 = vpop.eup %2381 }
 0x4eb   : > { %2389 = vpow2.f32 %v1149_v45 }
 0x4ec   : > { %2391 = vpow2.f32 %v1147_v40  ;;  %2180 = vmatprep.mubr.bf16.mxu0 %v1364_v26 }
 0x4ed   : > { %v3149_v29 = vpop.eup %2383 }
 0x4ee   : > { %v1365_v31 = vpack.c.bf16 %v3149_v29, %v3147_v2 }
 0x4f0   : > { %2181 = vmatmul.mubr.bf16.gmra.mrb[12].mxu0 %v1365_v31 }
 0x4f1   : > { %v3153_v23 = vpop.eup %2385 }
 0x4f2   : > { %v3155_v25 = vpop.eup %2387 }
 0x4f3   : > { %v1366_v3 = vpack.c.bf16 %v3153_v23, %v3155_v25 }
 0x4f5   : > { %v3159_v22 = vpop.eup %2389  ;;  %2184 = vmatprep.mubr.bf16.mxu0 %v1366_v3 }
 0x4f6   : > { %v3161_v28 = vpop.eup %2391 }
 0x4f7   : > { %v1367_v63 = vpack.c.bf16 %v3159_v22, %v3161_v28 }
 0x4f9   : > { %2185 = vmatmul.mubr.bf16.gmra.mrb[16].mxu0 %v1367_v63 }
 0x56b   : > { %v1518_v5 = vpop.xlane.xlu1 %1517 }
 0x56c   : > { %v3168_v27 = vmax.f32 %v3165_v16, %v1518_v5 }
 0x56e   : > { %1560 = vst.msk [vmem:[#allocation6] sm:$0x1] %vm1541_vm12, %v3168_v27  ;;  %1525 = vperm.xlu1 %2358, %v3168_v27  }
 0x5a8   : > { %v3175_v18 = vpop.f32.mrb[4].mxu0 }
 0x5a9   : > { %3530 = vst [vmem:[#allocation22_spill] sm:$0xff] %v3175_v18  ;;  %v3177_v21 = vpop.f32.mrb[5].mxu0 }
 0x5aa   : > { %3531 = vst [vmem:[#allocation23_spill] sm:$0xff] %v3177_v21  ;;  %v3179_v41 = vpop.f32.mrb[6].mxu0 }
 0x5ab   : > { %3532 = vst [vmem:[#allocation24_spill] sm:$0xff] %v3179_v41  ;;  %v3181_v24 = vpop.f32.mrb[7].mxu0 }
 0x5bb   : > { %v3183_v19 = vpop.f32.mrb[8].mxu0 }
 0x5bc   : > { %3533 = vst [vmem:[#allocation25_spill] sm:$0xff] %v3183_v19  ;;  %v3185_v45 = vpop.f32.mrb[9].mxu0 }
 0x5bd   : > { %3534 = vst [vmem:[#allocation26_spill] sm:$0xff] %v3185_v45  ;;  %v3187_v40 = vpop.f32.mrb[10].mxu0  ;;  %v3517_v45 = vlaneseq }
 0x5be   : > { %3535 = vst [vmem:[#allocation27_spill] sm:$0xff] %v3187_v40  ;;  %v3189_v26 = vpop.f32.mrb[11].mxu0 }
 0x5bf   : > { %3536 = vst [vmem:[#allocation28_spill] sm:$0xff] %v3189_v26  ;;  %v3208_v40 = vshrl.u32 %v3517_v45, 7  ;;  %v3546_v45 = vsub.f32 %v2950_v44, %v2958_v47 }
 0x5c1   : > { %3545 = vst [vmem:[#allocation37_spill] sm:$0xff] %v3208_v40 }
 0x5c3   : > { %v3191_v31 = vpop.f32.mrb[12].mxu0 }
 0x5c4   : > { %3537 = vst [vmem:[#allocation29_spill] sm:$0xff] %v3191_v31  ;;  %v3193_v3 = vpop.f32.mrb[13].mxu0  ;;  %v3211_v31 = vsub.s32 0, %v3208_v40  ;;  %v993_v40 = vmul.f32 1.442695, %v3546_v45 }
 0x5c5   : > { %3538 = vst [vmem:[#allocation30_spill] sm:$0xff] %v3193_v3  ;;  %v3195_v63 = vpop.f32.mrb[14].mxu0 }
 0x5c6   : > { %3539 = vst [vmem:[#allocation31_spill] sm:$0xff] %v3195_v63  ;;  %v3197_v5 = vpop.f32.mrb[15].mxu0 }
 0x5c7   : > { %3540 = vst [vmem:[#allocation32_spill] sm:$0xff] %v3197_v5 }
 0x5cc   : > { %v3199_v14 = vpop.f32.mrb[16].mxu0 }
 0x5cd   : > { %3541 = vst [vmem:[#allocation33_spill] sm:$0xff] %v3199_v14  ;;  %v3201_v18 = vpop.f32.mrb[17].mxu0 }
 0x5ce   : > { %3542 = vst [vmem:[#allocation34_spill] sm:$0xff] %v3201_v18  ;;  %v3203_v41 = vpop.f32.mrb[18].mxu0 }
 0x5cf   : > { %3543 = vst [vmem:[#allocation35_spill] sm:$0xff] %v3203_v41  ;;  %v3205_v19 = vpop.f32.mrb[19].mxu0 }
 0x5d0   : > { %3544 = vst [vmem:[#allocation36_spill] sm:$0xff] %v3205_v19 }
 0x5ed   : > { %v1526_v3 = vpop.permute.xlu1 %1525 }
 0x5ee   : > { %v1531_v63 = vrot.slane %v1526_v3, %v3211_v31  ;;  %v3547_v3 = vsub.f32 %v2927_v34, %v2933_v38  ;;  %v3551_v34 = vsub.f32 %v2973_v53, %v2983_v58  ;;  %v3554_v53 = vsub.f32 %v3054_v57, %v3062_v8 }
 0x5ef   : > { %v3557_v8 = vsub.f32 %v3014_v9, %v3031_v15 }
 0x5f0   : > { %v1532_v5 = vsub.f32 %v3119_v49, %v1531_v63  ;;  %v991_v21 = vmul.f32 1.442695, %v3547_v3  ;;  %v3548_v49 = vsub.f32 %v2935_v39, %v2948_v43  ;;  %v999_v38 = vmul.f32 1.442695, %v3551_v34 }
 0x5f1   : > { %v3552_v39 = vsub.f32 %v2988_v60, %v3000_v0  ;;  %v1013_v58 = vmul.f32 1.442695, %v3554_v53  ;;  %v3555_v0 = vsub.f32 %v2975_v54, %v2986_v59  ;;  %v3558_v59 = vsub.f32 %v3064_v13, %v3072_v51 }
 0x5f2   : > { %v1533_v26 = vmul.f32 1.442695, %v1532_v5  ;;  %v3560_v63 = vsub.f32 %v3074_v50, %v3083_v42  ;;  %v3561_v42 = vsub.f32 %v3165_v16, %v3168_v27 }
 0x5f3   : > { %v1005_v43 = vmul.f32 1.442695, %v3552_v39 }
 0x5f4   : > { %2393 = vpow2.f32 %v1533_v26  ;;  %v997_v26 = vmul.f32 1.442695, %v3548_v49  ;;  %v1021_v5 = vmul.f32 1.442695, %v3560_v63  ;;  %v1521_v50 = vmul.f32 1.442695, %v3561_v42 }
 0x5f5   : > { %2395 = vpow2.f32 %v993_v40 }
 0x5f6   : > { %2397 = vpow2.f32 %v991_v21 }
 0x5f7   : > { %2399 = vpow2.f32 %v997_v26  ;;  %v1251_v26 = vld [vmem:[#allocation5 + $0x18] sm:$0xff] }
 0x5fe   : > { %v2394_v14 = vpop.eup %2393 }
 0x5ff   : > { %v1537_v18 = vsel %vm1515_vm11, %v2394_v14, 0.0  ;;  %v1554_v41 = vrot.slane %v2394_v14, %v3211_v31  ;;  %v3549_v14 = vsub.f32 %v2925_v33, %v2930_v36  ;;  %v3239_v47 = vpop.eup %2395  ;;  %v3553_v33 = vsub.f32 %v2960_v48, %v2971_v52 }
 0x600   : > { %1538 = vadd.xlane.f32.xlu0 %v1537_v18  ;;  %v1011_v48 = vmul.f32 1.442695, %v3555_v0  ;;  %v3566_v0 = vld [vmem:[#allocation22_spill] sm:$0xff] }
 0x601   : > { %v1555_v19 = vmul.f32 %v1554_v41, %v3096_v37  ;;  %v995_v18 = vmul.f32 1.442695, %v3549_v14  ;;  %v3550_v37 = vsub.f32 %v3002_v1, %v3012_v6  ;;  %v1003_v36 = vmul.f32 1.442695, %v3553_v33  ;;  %v3245_v1 = vpop.eup %2397  ;;  %v1253_v33 = vld [vmem:[#allocation5 + $0x28] sm:$0xff] }
 0x602   : > { %v3251_v60 = vpop.eup %2399  ;;  %v3556_v6 = vsub.f32 %v3033_v35, %v3052_v56  ;;  %v1007_v41 = vmul.f32 1.442695, %v3557_v8  ;;  %v1017_v35 = vmul.f32 1.442695, %v3558_v59  ;;  %v3567_v59 = vld [vmem:[#allocation28_spill] sm:$0xff] }
 0x603   : > { %1556 = vadd.xlane.f32.xlu1 %v1555_v19  ;;  %v1001_v44 = vmul.f32 1.442695, %v3550_v37  ;;  %2401 = vpow2.f32 %v995_v18  ;;  %v3559_v19 = vsub.f32 %v3009_v4, %v3017_v10  ;;  %v1250_v18 = vld [vmem:[#allocation5 + $0x10] sm:$0xff]  ;;  %v3564_v37 = vld [vmem:[#allocation23_spill] sm:$0xff] }
 0x604   : > { %v1009_v21 = vmul.f32 1.442695, %v3556_v6 }
 0x605   : > { %2403 = vpow2.f32 %v1001_v44  ;;  %v1015_v45 = vmul.f32 1.442695, %v3559_v19  ;;  %v1254_v19 = vld [vmem:[#allocation5 + $0x30] sm:$0xff] }
 0x606   : > { %2405 = vpow2.f32 %v999_v38 }
 0x607   : > { %2407 = vpow2.f32 %v1005_v43 }
 0x608   : > { %2409 = vpow2.f32 %v1003_v36  ;;  %v3565_v36 = vld [vmem:[#allocation24_spill] sm:$0xff] }
 0x609   : > { %2411 = vpow2.f32 %v1013_v58  ;;  %v1252_v58 = vld [vmem:[#allocation5 + $0x20] sm:$0xff] }
 0x60a   : > { %2413 = vpow2.f32 %v1011_v48 }
 0x60b   : > { %2415 = vpow2.f32 %v1009_v21 }
 0x60c   : > { %2417 = vpow2.f32 %v1007_v41  ;;  %v1255_v41 = vld [vmem:[#allocation5 + $0x38] sm:$0xff] }
 0x60d   : > { %v3257_v52 = vpop.eup %2401  ;;  %2419 = vpow2.f32 %v1017_v35 }
 0x60e   : > { %2421 = vpow2.f32 %v1015_v45  ;;  %v3568_v45 = vld [vmem:[#allocation26_spill] sm:$0xff] }
 0x60f   : > { %v3263_v57 = vpop.eup %2403  ;;  %2423 = vpow2.f32 %v1021_v5 }
 0x610   : > { %v3269_v54 = vpop.eup %2405  ;;  %2425 = vpow2.f32 %v1521_v50 }
 0x611   : > { %v3275_v56 = vpop.eup %2407 }
 0x612   : > { %v3281_v9 = vpop.eup %2409 }
 0x613   : > { %v3284_v15 = vpop.eup %2411 }
 0x614   : > { %1271 = vperm.xlu1 %2358, %v3239_v47   ;;  %v3287_v51 = vpop.eup %2413 }
 0x615   : > { %v3290_v13 = vpop.eup %2415 }
 0x616   : > { %1266 = vperm.xlu0 %2357, %v3245_v1   ;;  %v3293_v4 = vpop.eup %2417 }
 0x617   : > { %v3296_v10 = vpop.eup %2419 }
 0x618   : > { %1281 = vperm.xlu1 %2358, %v3251_v60   ;;  %v3299_v40 = vpop.eup %2421 }
 0x61a   : > { %1276 = vperm.xlu0 %2357, %v3257_v52  }
 0x61c   : > { %1291 = vperm.xlu1 %2358, %v3263_v57  }
 0x61e   : > { %1286 = vperm.xlu0 %2357, %v3269_v54  }
 0x620   : > { %1301 = vperm.xlu1 %2358, %v3275_v56  }
 0x622   : > { %1296 = vperm.xlu0 %2357, %v3281_v9  }
 0x624   : > { %1321 = vperm.xlu1 %2358, %v3284_v15  }
 0x626   : > { %1316 = vperm.xlu0 %2357, %v3287_v51  }
 0x628   : > { %1311 = vperm.xlu1 %2358, %v3290_v13  }
 0x62a   : > { %1306 = vperm.xlu0 %2357, %v3293_v4  }
 0x62c   : > { %1331 = vperm.xlu1 %2358, %v3296_v10  }
 0x62e   : > { %1326 = vperm.xlu0 %2357, %v3299_v40  }
 0x64d   : > { %1183 = vadd.xlane.f32.xlu0 %v3101_v20  ;;  %v3313_v20 = vpop.eup %2423 }
 0x650   : > { %1187 = vadd.xlane.f32.xlu1 %v3107_v62 }
 0x651   : > { %1189 = vadd.xlane.f32.xlu0 %v3103_v55  ;;  %v2426_v55 = vpop.eup %2425 }
 0x654   : > { %1199 = vadd.xlane.f32.xlu1 %v3141_v32  ;;  %v1543_v32 = vld [vmem:[#allocation8] sm:$0xff] }
 0x655   : > { %1185 = vadd.xlane.f32.xlu0 %v3105_v61  ;;  %v3562_v61 = vld [vmem:[#allocation21_spill] sm:$0xff] }
 0x656   : > { %v3563_v62 = vsub.f32 %v3024_v12, %v3562_v61  ;;  %v1259_v61 = vld [vmem:[#allocation5 + $0x58] sm:$0xff] }
 0x659   : > { %1195 = vadd.xlane.f32.xlu0 %v3133_v46  ;;  %v1548_v46 = vrot.slane %v2426_v55, %v3211_v31 }
 0x65d   : > { %1191 = vadd.xlane.f32.xlu0 %v3125_v7  ;;  %v1019_v7 = vmul.f32 1.442695, %v3563_v62  ;;  %v3569_v62 = vld [vmem:[#allocation27_spill] sm:$0xff] }
 0x65f   : > { %2427 = vpow2.f32 %v1019_v7 }
 0x661   : > { %1197 = vadd.xlane.f32.xlu0 %v3135_v17 }
 0x665   : > { %1341 = vperm.xlu1 %2358, %v3313_v20   ;;  %1193 = vadd.xlane.f32.xlu0 %v3127_v11  ;;  %v1535_v11 = vld [vmem:[#allocation7] sm:$0x1] }
 0x666   : > { %v1536_v17 = vmul.f32 %v2426_v55, %v1535_v11  ;;  %v1258_v11 = vld [vmem:[#allocation5 + $0x50] sm:$0xff] }
 0x669   : > { %1203 = vadd.xlane.f32.xlu0 %v3147_v2  ;;  %v3333_v3 = vpop.eup %2427 }
 0x66d   : > { %1205 = vadd.xlane.f32.xlu0 %v3149_v29  ;;  %v1550_v29 = vmul.f32 %v1548_v46, %v1543_v32  ;;  %v3570_v46 = vld [vmem:[#allocation25_spill] sm:$0xff] }
 0x671   : > { %1201 = vadd.xlane.f32.xlu0 %v3143_v30 }
 0x675   : > { %1211 = vadd.xlane.f32.xlu0 %v3161_v28  ;;  %v1249_v28 = vld [vmem:[#allocation5 + $0x8] sm:$0xff] }
 0x679   : > { %1207 = vadd.xlane.f32.xlu0 %v3155_v25 }
 0x67d   : > { %1213 = vadd.xlane.f32.xlu0 %v3159_v22 }
 0x681   : > { %1209 = vadd.xlane.f32.xlu0 %v3153_v23  ;;  %v1248_v23 = vld [vmem:[#allocation5] sm:$0xff] }
 0x68d   : > { %v1539_v30 = vpop.xlane.xlu0 %1538 }
 0x68e   : > { %v1540_v2 = vadd.f32 %v1539_v30, %v1536_v17 }
 0x690   : > { %1542 = vst.msk [vmem:[#allocation7] sm:$0x1] %vm1541_vm12, %v1540_v2  ;;  %v1557_v25 = vpop.xlane.xlu1 %1556 }
 0x691   : > { %v1558_v22 = vadd.f32 %v1557_v25, %v1550_v29  ;;  %v1257_v25 = vld [vmem:[#allocation5 + $0x48] sm:$0xff] }
 0x693   : > { %1559 = vst.msk [vmem:[#allocation8] sm:$0xff] %vm1231_vm10, %v1558_v22  ;;  %v3571_v22 = vld [vmem:[#allocation31_spill] sm:$0xff] }
 0x694   : > { %v1272_v16 = vpop.permute.xlu1 %1271 }
 0x695   : > { %v1345_v12 = vmul.f32 %v1272_v16, %v1249_v28  ;;  %v1267_v27 = vpop.permute.xlu0 %1266  ;;  %v3572_v16 = vld [vmem:[#allocation29_spill] sm:$0xff] }
 0x696   : > { %v1344_v49 = vmul.f32 %v1267_v27, %v1248_v23  ;;  %v1256_v23 = vld [vmem:[#allocation5 + $0x40] sm:$0xff] }
 0x697   : > { %v1467_v14 = vadd.f32 %v3181_v24, %v1345_v12  ;;  %1336 = vperm.xlu0 %2357, %v3333_v3  }
 0x698   : > { %v1466_v44 = vadd.f32 %v3564_v37, %v1344_v49  ;;  %v1282_v34 = vpop.permute.xlu1 %1281  ;;  %v3573_v37 = vld [vmem:[#allocation32_spill] sm:$0xff] }
 0x699   : > { %1483 = vst.msk [vmem:[#allocation5 + $0x8] sm:$0xff] %vm785_vm8, %v1467_v14  ;;  %v1347_v38 = vmul.f32 %v1282_v34, %v1251_v26  ;;  %v1277_v39 = vpop.permute.xlu0 %1276  ;;  %v1260_v34 = vld [vmem:[#allocation5 + $0x60] sm:$0xff] }
 0x69a   : > { %1482 = vst.msk [vmem:[#allocation5] sm:$0xff] %vm785_vm8, %v1466_v44  ;;  %v1346_v43 = vmul.f32 %v1277_v39, %v1250_v18  ;;  %v1261_v18 = vld [vmem:[#allocation5 + $0x68] sm:$0xff] }
 0x69b   : > { %v1469_v53 = vadd.f32 %v3565_v36, %v1347_v38  ;;  %v3574_v38 = vld [vmem:[#allocation30_spill] sm:$0xff] }
 0x69c   : > { %v1468_v48 = vadd.f32 %v3566_v0, %v1346_v43  ;;  %v1292_v24 = vpop.permute.xlu1 %1291 }
 0x69d   : > { %1485 = vst.msk [vmem:[#allocation5 + $0x18] sm:$0xff] %vm785_vm8, %v1469_v53  ;;  %v1349_v6 = vmul.f32 %v1292_v24, %v1253_v33  ;;  %v1287_v21 = vpop.permute.xlu0 %1286 }
 0x69e   : > { %1484 = vst.msk [vmem:[#allocation5 + $0x10] sm:$0xff] %vm785_vm8, %v1468_v48  ;;  %v1348_v8 = vmul.f32 %v1287_v21, %v1252_v58  ;;  %v3575_v58 = vld [vmem:[#allocation36_spill] sm:$0xff]  ;;  %v3576_v48 = vld [vmem:[#allocation34_spill] sm:$0xff] }
 0x69f   : > { %v1471_v35 = vadd.f32 %v3567_v59, %v1349_v6  ;;  %v1151_v6 = vld [vmem:[#allocation4] sm:$0xff]  ;;  %v1154_v59 = vld [vmem:[#allocation4 + $0x18] sm:$0xff] }
 0x6a0   : > { %v1470_v63 = vadd.f32 %v3568_v45, %v1348_v8  ;;  %v1302_v5 = vpop.permute.xlu1 %1301  ;;  %v1167_v21 = vmul.f32 %v3245_v1, %v1151_v6  ;;  %v1153_v8 = vld [vmem:[#allocation4 + $0x10] sm:$0xff] }
 0x6a1   : > { %1487 = vst.msk [vmem:[#allocation5 + $0x28] sm:$0xff] %vm785_vm8, %v1471_v35  ;;  %v1351_v42 = vmul.f32 %v1302_v5, %v1255_v41  ;;  %v1297_v50 = vpop.permute.xlu0 %1296  ;;  %v1159_v5 = vld [vmem:[#allocation4 + $0x40] sm:$0xff] }
 0x6a2   : > { %1486 = vst.msk [vmem:[#allocation5 + $0x20] sm:$0xff] %vm785_vm8, %v1470_v63  ;;  %v1350_v55 = vmul.f32 %v1297_v50, %v1254_v19  ;;  %v1169_v19 = vmul.f32 %v3257_v52, %v1153_v8  ;;  %v1170_v63 = vmul.f32 %v3251_v60, %v1154_v59  ;;  %v1175_v1 = vmul.f32 %v3293_v4, %v1159_v5  ;;  %v1155_v4 = vld [vmem:[#allocation4 + $0x20] sm:$0xff]  ;;  %v1166_v8 = vld [vmem:[#allocation4 + $0x78] sm:$0xff]  ;;  %v1262_v5 = vld [vmem:[#allocation5 + $0x70] sm:$0xff] }
 0x6a3   : > { %v1473_v7 = vadd.f32 %v3569_v62, %v1351_v42 }
 0x6a4   : > { %v1472_v17 = vadd.f32 %v3570_v46, %v1350_v55  ;;  %v1322_v32 = vpop.permute.xlu1 %1321  ;;  %v1152_v55 = vld [vmem:[#allocation4 + $0x8] sm:$0xff]  ;;  %v1157_v46 = vld [vmem:[#allocation4 + $0x30] sm:$0xff] }
 0x6a5   : > { %1489 = vst.msk [vmem:[#allocation5 + $0x38] sm:$0xff] %vm785_vm8, %v1473_v7  ;;  %v1355_v30 = vmul.f32 %v1322_v32, %v1259_v61  ;;  %v1317_v2 = vpop.permute.xlu0 %1316  ;;  %v1168_v7 = vmul.f32 %v3239_v47, %v1152_v55  ;;  %v1263_v32 = vld [vmem:[#allocation5 + $0x78] sm:$0xff]  ;;  %v1171_v47 = vmul.f32 %v3269_v54, %v1155_v4 }
 0x6a6   : > { %1488 = vst.msk [vmem:[#allocation5 + $0x30] sm:$0xff] %vm785_vm8, %v1472_v17  ;;  %v1354_v29 = vmul.f32 %v1317_v2, %v1258_v11 }
 0x6a7   : > { %v1477_v28 = vadd.f32 %v3571_v22, %v1355_v30  ;;  %v1173_v30 = vmul.f32 %v3281_v9, %v1157_v46  ;;  %v3577_v22 = vld [vmem:[#allocation35_spill] sm:$0xff] }
 0x6a8   : > { %v1476_v12 = vadd.f32 %v3572_v16, %v1354_v29  ;;  %v1312_v27 = vpop.permute.xlu1 %1311  ;;  %v1158_v16 = vld [vmem:[#allocation4 + $0x38] sm:$0xff] }
 0x6a9   : > { %1493 = vst.msk [vmem:[#allocation5 + $0x58] sm:$0xff] %vm785_vm8, %v1477_v28  ;;  %v1353_v49 = vmul.f32 %v1312_v27, %v1257_v25  ;;  %v1307_v26 = vpop.permute.xlu0 %1306  ;;  %v1174_v27 = vmul.f32 %v3275_v56, %v1158_v16  ;;  %v2584_v16 = vmov (!%p2033_p3), 0.0|0.0  }
 0x6aa   : > { %1492 = vst.msk [vmem:[#allocation5 + $0x50] sm:$0xff] %vm785_vm8, %v1476_v12  ;;  %v1352_v14 = vmul.f32 %v1307_v26, %v1256_v23  ;;  %2223 = vmatprep.subr.bf16.mxu0 (!%p2033_p3), %v2584_v16 }
 0x6ab   : > { %v1475_v44 = vadd.f32 %v3573_v37, %v1353_v49  ;;  %v1156_v49 = vld [vmem:[#allocation4 + $0x28] sm:$0xff]  ;;  %v1161_v37 = vld [vmem:[#allocation4 + $0x50] sm:$0xff] }
 0x6ac   : > { %v1474_v39 = vadd.f32 %v3574_v38, %v1352_v14  ;;  %v1332_v43 = vpop.permute.xlu1 %1331  ;;  %v1172_v14 = vmul.f32 %v3263_v57, %v1156_v49  ;;  %v1177_v54 = vmul.f32 %v3287_v51, %v1161_v37  ;;  %v1162_v38 = vld [vmem:[#allocation4 + $0x58] sm:$0xff] }
 0x6ad   : > { %1491 = vst.msk [vmem:[#allocation5 + $0x48] sm:$0xff] %vm785_vm8, %v1475_v44  ;;  %v1357_v33 = vmul.f32 %v1332_v43, %v1261_v18  ;;  %v1327_v36 = vpop.permute.xlu0 %1326  ;;  %v1178_v56 = vmul.f32 %v3284_v15, %v1162_v38 }
 0x6ae   : > { %1490 = vst.msk [vmem:[#allocation5 + $0x40] sm:$0xff] %vm785_vm8, %v1474_v39  ;;  %v1356_v53 = vmul.f32 %v1327_v36, %v1260_v34 }
 0x6af   : > { %v1479_v0 = vadd.f32 %v3575_v58, %v1357_v33  ;;  %v1160_v33 = vld [vmem:[#allocation4 + $0x48] sm:$0xff]  ;;  %v1165_v58 = vld [vmem:[#allocation4 + $0x70] sm:$0xff] }
 0x6b0   : > { %v1478_v24 = vadd.f32 %v3576_v48, %v1356_v53  ;;  %v1176_v57 = vmul.f32 %v3290_v13, %v1160_v33  ;;  %v1181_v51 = vmul.f32 %v3333_v3, %v1165_v58  ;;  %v1182_v13 = vmul.f32 %v3313_v20, %v1166_v8  ;;  %v1837_v33 = vld [vmem:[#allocation8] sm:$0xff] (!%p2033_p3)  ;;  %v1568_v8 = vld [vmem:[#allocation5 + $0x18] sm:$0xff] (!%p2033_p3) }
 0x6b1   : > { %1495 = vst.msk [vmem:[#allocation5 + $0x68] sm:$0xff] %vm785_vm8, %v1479_v0  ;;  %v1565_v58 = vld [vmem:[#allocation5] sm:$0xff] (!%p2033_p3) }
 0x6b2   : > { %1494 = vst.msk [vmem:[#allocation5 + $0x60] sm:$0xff] %vm785_vm8, %v1478_v24  ;;  %v1163_v24 = vld [vmem:[#allocation4 + $0x60] sm:$0xff] }
 0x6b3   : > { %v1179_v15 = vmul.f32 %v3299_v40, %v1163_v24 }
 0x6da   : > { %v1184_v41 = vpop.xlane.xlu0 %1183 }
 0x6db   : > { %v1215_v35 = vadd.f32 %v1184_v41, %v1167_v21 }
 0x6dd   : > { %1232 = vst.msk [vmem:[#allocation4] sm:$0xff] %vm1231_vm10, %v1215_v35  ;;  %v1188_v45 = vpop.xlane.xlu1 %1187  ;;  %v1164_v35 = vld [vmem:[#allocation4 + $0x68] sm:$0xff] }
 0x6de   : > { %v1217_v42 = vadd.f32 %v1188_v45, %v1169_v19  ;;  %v1190_v50 = vpop.xlane.xlu0 %1189  ;;  %v1180_v3 = vmul.f32 %v3296_v10, %v1164_v35 }
 0x6df   : > { %v1218_v61 = vadd.f32 %v1190_v50, %v1170_v63  ;;  %v3578_v50 = vld [vmem:[#allocation33_spill] sm:$0xff] }
 0x6e0   : > { %1234 = vst.msk [vmem:[#allocation4 + $0x10] sm:$0xff] %vm1231_vm10, %v1217_v42 }
 0x6e1   : > { %1235 = vst.msk [vmem:[#allocation4 + $0x18] sm:$0xff] %vm1231_vm10, %v1218_v61  ;;  %v1200_v62 = vpop.xlane.xlu1 %1199 }
 0x6e2   : > { %v1223_v52 = vadd.f32 %v1200_v62, %v1175_v1  ;;  %v1186_v11 = vpop.xlane.xlu0 %1185  ;;  %v2583_v62 = vmov (!%p2033_p3), 0  }
 0x6e3   : > { %v1216_v17 = vadd.f32 %v1186_v11, %v1168_v7  ;;  %2430 = vset.pattern.permute.xlu1 (!%p2033_p3), %v2583_v62  ;;  %2429 = vset.pattern.permute.xlu0 (!%p2033_p3), %v2583_v62 }
 0x6e4   : > { %1240 = vst.msk [vmem:[#allocation4 + $0x40] sm:$0xff] %vm1231_vm10, %v1223_v52  ;;  %v1581_v61 = vld [vmem:[#allocation4] sm:$0xff] (!%p2033_p3) }
 0x6e5   : > { %1233 = vst.msk [vmem:[#allocation4 + $0x8] sm:$0xff] %vm1231_vm10, %v1216_v17  ;;  %v1342_v60 = vpop.permute.xlu1 %1341 }
 0x6e6   : > { %v1359_v2 = vmul.f32 %v1342_v60, %v1263_v32  ;;  %v1196_v29 = vpop.xlane.xlu0 %1195 }
 0x6e7   : > { %v1221_v25 = vadd.f32 %v1196_v29, %v1173_v30  ;;  %v1583_v20 = vld [vmem:[#allocation4 + $0x10] sm:$0xff] (!%p2033_p3) }
 0x6e8   : > { %v1481_v28 = vadd.f32 %v3577_v22, %v1359_v2  ;;  %v1584_v1 = vld [vmem:[#allocation4 + $0x18] sm:$0xff] (!%p2033_p3)  ;;  %2431 = vrcp.f32 (!%p2033_p3), %v1583_v20 }
 0x6e9   : > { %1238 = vst.msk [vmem:[#allocation4 + $0x30] sm:$0xff] %vm1231_vm10, %v1221_v25  ;;  %2433 = vrcp.f32 (!%p2033_p3), %v1581_v61  ;;  %v1571_v61 = vld [vmem:[#allocation5 + $0x30] sm:$0xff] (!%p2033_p3) }
 0x6ea   : > { %1497 = vst.msk [vmem:[#allocation5 + $0x78] sm:$0xff] %vm785_vm8, %v1481_v28  ;;  %v1192_v23 = vpop.xlane.xlu0 %1191  ;;  %2435 = vrcp.f32 (!%p2033_p3), %v1584_v1 }
 0x6eb   : > { %v1219_v12 = vadd.f32 %v1192_v23, %v1171_v47  ;;  %v1589_v2 = vld [vmem:[#allocation4 + $0x40] sm:$0xff] (!%p2033_p3) }
 0x6ec   : > { %v1582_v10 = vld [vmem:[#allocation4 + $0x8] sm:$0xff] (!%p2033_p3) }
 0x6ed   : > { %1236 = vst.msk [vmem:[#allocation4 + $0x20] sm:$0xff] %vm1231_vm10, %v1219_v12  ;;  %2437 = vrcp.f32 (!%p2033_p3), %v1582_v10 }
 0x6ee   : > { %v1198_v9 = vpop.xlane.xlu0 %1197 }
 0x6ef   : > { %v1222_v26 = vadd.f32 %v1198_v9, %v1174_v27  ;;  %v1838_v27 = vld [vmem:[#allocation7] sm:$0x1] (!%p2033_p3) }
 0x6f0   : > { %v1587_v46 = vld [vmem:[#allocation4 + $0x30] sm:$0xff] (!%p2033_p3) }
 0x6f1   : > { %1239 = vst.msk [vmem:[#allocation4 + $0x38] sm:$0xff] %vm1231_vm10, %v1222_v26 }
 0x6f2   : > { %v1194_v18 = vpop.xlane.xlu0 %1193  ;;  %v2432_v17 = vpop.eup (!%p2033_p3), %2431 }
 0x6f3   : > { %v1220_v44 = vadd.f32 %v1194_v18, %v1172_v14  ;;  %v2434_v32 = vpop.eup (!%p2033_p3), %2433  ;;  %1625 = vperm.xlu1 (!%p2033_p3), %2430, %v2432_v17  }
 0x6f4   : > { %v1585_v52 = vld [vmem:[#allocation4 + $0x20] sm:$0xff] (!%p2033_p3)  ;;  %v2436_v30 = vpop.eup (!%p2033_p3), %2435  ;;  %1615 = vperm.xlu0 (!%p2033_p3), %2429, %v2434_v32  }
 0x6f5   : > { %1237 = vst.msk [vmem:[#allocation4 + $0x28] sm:$0xff] %vm1231_vm10, %v1220_v44 }
 0x6f6   : > { %v1204_v34 = vpop.xlane.xlu0 %1203 }
 0x6f7   : > { %v1225_v39 = vadd.f32 %v1204_v34, %v1177_v54  ;;  %v2438_v29 = vpop.eup (!%p2033_p3), %2437  ;;  %1630 = vperm.xlu1 (!%p2033_p3), %2430, %v2436_v30  }
 0x6f8   : > { %v1588_v11 = vld [vmem:[#allocation4 + $0x38] sm:$0xff] (!%p2033_p3)  ;;  %1620 = vperm.xlu0 (!%p2033_p3), %2429, %v2438_v29  }
 0x6f9   : > { %1242 = vst.msk [vmem:[#allocation4 + $0x50] sm:$0xff] %vm1231_vm10, %v1225_v39 }
 0x6fa   : > { %v1206_v43 = vpop.xlane.xlu0 %1205 }
 0x6fb   : > { %v1226_v36 = vadd.f32 %v1206_v43, %v1178_v56 }
 0x6fc   : > { %v1586_v7 = vld [vmem:[#allocation4 + $0x28] sm:$0xff] (!%p2033_p3) }
 0x6fd   : > { %1243 = vst.msk [vmem:[#allocation4 + $0x58] sm:$0xff] %vm1231_vm10, %v1226_v36  ;;  %2439 = vrcp.f32 (!%p2033_p3), %v1586_v7 }
 0x6fe   : > { %v1202_v53 = vpop.xlane.xlu0 %1201  ;;  %2441 = vrcp.f32 (!%p2033_p3), %v1585_v52  ;;  %v1574_v52 = vld [vmem:[#allocation5 + $0x48] sm:$0xff] (!%p2033_p3) }
 0x6ff   : > { %v1224_v0 = vadd.f32 %v1202_v53, %v1176_v57  ;;  %2443 = vrcp.f32 (!%p2033_p3), %v1588_v11  ;;  %v2586_v57 = vmov (!%p2033_p3), 0.0  }
 0x700   : > { %2445 = vrcp.f32 (!%p2033_p3), %v1587_v46  ;;  %v1591_v22 = vld [vmem:[#allocation4 + $0x50] sm:$0xff] (!%p2033_p3)  ;;  %2220 = vmatprep.mubr.msk.f32.mxu0 (!%p2033_p3), %vm2585_vm13, %v2586_v57  ;;  %v1573_v46 = vld [vmem:[#allocation5 + $0x40] sm:$0xff] (!%p2033_p3) }
 0x701   : > { %1241 = vst.msk [vmem:[#allocation4 + $0x48] sm:$0xff] %vm1231_vm10, %v1224_v0  ;;  %v1566_v0 = vld [vmem:[#allocation5 + $0x8] sm:$0xff] (!%p2033_p3) }
 0x702   : > { %v1212_v48 = vpop.xlane.xlu0 %1211 }
 0x703   : > { %v1229_v6 = vadd.f32 %v1212_v48, %v1181_v51 }
 0x704   : > { %v1592_v4 = vld [vmem:[#allocation4 + $0x58] sm:$0xff] (!%p2033_p3) }
 0x705   : > { %1246 = vst.msk [vmem:[#allocation4 + $0x70] sm:$0xff] %vm1231_vm10, %v1229_v6 }
 0x706   : > { %v1208_v21 = vpop.xlane.xlu0 %1207 }
 0x707   : > { %v1227_v41 = vadd.f32 %v1208_v21, %v1179_v15  ;;  %v2440_v25 = vpop.eup (!%p2033_p3), %2439  ;;  %v1567_v21 = vld [vmem:[#allocation5 + $0x10] sm:$0xff] (!%p2033_p3) }
 0x708   : > { %v1590_v60 = vld [vmem:[#allocation4 + $0x48] sm:$0xff] (!%p2033_p3)  ;;  %v2442_v28 = vpop.eup (!%p2033_p3), %2441  ;;  %1640 = vperm.xlu1 (!%p2033_p3), %2430, %v2440_v25  }
 0x709   : > { %1244 = vst.msk [vmem:[#allocation4 + $0x60] sm:$0xff] %vm1231_vm10, %v1227_v41  ;;  %2447 = vrcp.f32 (!%p2033_p3), %v1590_v60  ;;  %v2444_v12 = vpop.eup (!%p2033_p3), %2443  ;;  %1635 = vperm.xlu0 (!%p2033_p3), %2429, %v2442_v28  }
 0x70a   : > { %v1214_v59 = vpop.xlane.xlu0 %1213  ;;  %2449 = vrcp.f32 (!%p2033_p3), %v1589_v2  ;;  %v2446_v9 = vpop.eup (!%p2033_p3), %2445  ;;  %v1576_v2 = vld [vmem:[#allocation5 + $0x58] sm:$0xff] (!%p2033_p3) }
 0x70b   : > { %v1230_v19 = vadd.f32 %v1214_v59, %v1182_v13  ;;  %2451 = vrcp.f32 (!%p2033_p3), %v1592_v4  ;;  %v1575_v4 = vld [vmem:[#allocation5 + $0x50] sm:$0xff] (!%p2033_p3) }
 0x70c   : > { %2453 = vrcp.f32 (!%p2033_p3), %v1591_v22  ;;  %1650 = vperm.xlu1 (!%p2033_p3), %2430, %v2444_v12   ;;  %v1595_v14 = vld [vmem:[#allocation4 + $0x70] sm:$0xff] (!%p2033_p3) }
 0x70d   : > { %1247 = vst.msk [vmem:[#allocation4 + $0x78] sm:$0xff] %vm1231_vm10, %v1230_v19  ;;  %1645 = vperm.xlu0 (!%p2033_p3), %2429, %v2446_v9  }
 0x70e   : > { %v1210_v45 = vpop.xlane.xlu0 %1209 }
 0x70f   : > { %v1228_v63 = vadd.f32 %v1210_v45, %v1180_v3  ;;  %v1570_v3 = vld [vmem:[#allocation5 + $0x28] sm:$0xff] (!%p2033_p3) }
 0x710   : > { %v1593_v23 = vld [vmem:[#allocation4 + $0x60] sm:$0xff] (!%p2033_p3) }
 0x711   : > { %1245 = vst.msk [vmem:[#allocation4 + $0x68] sm:$0xff] %vm1231_vm10, %v1228_v63  ;;  %v1569_v63 = vld [vmem:[#allocation5 + $0x20] sm:$0xff] (!%p2033_p3) }
 0x713   : > { %v2448_v26 = vpop.eup (!%p2033_p3), %2447 }
 0x714   : > { %v1596_v49 = vld [vmem:[#allocation4 + $0x78] sm:$0xff] (!%p2033_p3)  ;;  %v2450_v18 = vpop.eup (!%p2033_p3), %2449  ;;  %1660 = vperm.xlu1 (!%p2033_p3), %2430, %v2448_v26  }
 0x715   : > { %1564 = sbr.rel (%p2033_p3) target bundleno = 2199 (0x897), region = 56  ;;  %v2452_v37 = vpop.eup (!%p2033_p3), %2451  ;;  %1655 = vperm.xlu0 (!%p2033_p3), %2429, %v2450_v18   ;;  %v1580_v18 = vld [vmem:[#allocation5 + $0x78] sm:$0xff] (!%p2033_p3) }
 0x716   : > { %v1337_v40 = vpop.permute.xlu0 %1336  ;;  %v2454_v44 = vpop.eup (!%p2033_p3), %2453 }
 0x717   : > { %v1358_v42 = vmul.f32 %v1337_v40, %v1262_v5 }
 0x718   : > { %v1594_v47 = vld [vmem:[#allocation4 + $0x68] sm:$0xff] (!%p2033_p3)  ;;  %1670 = vperm.xlu1 (!%p2033_p3), %2430, %v2452_v37  }
 0x719   : > { %v1480_v55 = vadd.f32 %v3578_v50, %v1358_v42  ;;  %2455 = vrcp.f32 (!%p2033_p3), %v1594_v47  ;;  %1665 = vperm.xlu0 (!%p2033_p3), %2429, %v2454_v44  }
 0x71a   : > { %2457 = vrcp.f32 (!%p2033_p3), %v1593_v23  ;;  %v1578_v23 = vld [vmem:[#allocation5 + $0x68] sm:$0xff] (!%p2033_p3) }
 0x71b   : > { %1496 = vst.msk [vmem:[#allocation5 + $0x70] sm:$0xff] %vm785_vm8, %v1480_v55  ;;  %2459 = vrcp.f32 (!%p2033_p3), %v1838_v27  ;;  %v1572_v55 = vld [vmem:[#allocation5 + $0x38] sm:$0xff] (!%p2033_p3)  ;;  %v1577_v27 = vld [vmem:[#allocation5 + $0x60] sm:$0xff] (!%p2033_p3) }
 0x71c   : > { %2461 = vrcp.f32 %v1596_v49 }
 0x71d   : > { %2463 = vrcp.f32 %v1595_v14 }
 0x722   : > { %v1579_v44 = vld [vmem:[#allocation5 + $0x70] sm:$0xff] }
 0x723   : > { %v2456_v54 = vpop.eup %2455 }
 0x724   : > { %v2458_v34 = vpop.eup %2457  ;;  %1680 = vperm.xlu1 %2430, %v2456_v54  }
 0x725   : > { %v2460_v38 = vpop.eup %2459  ;;  %1675 = vperm.xlu0 %2429, %v2458_v34  }
 0x726   : > { %v2462_v39 = vpop.eup %2461  ;;  %v1844_v56 = vrot.slane %v2460_v38, %v3211_v31  ;;  %v3581_v38 = vlaneseq }
 0x727   : > { %v2464_v43 = vpop.eup %2463 }
 0x728   : > { %1690 = vperm.xlu1 %2430, %v2462_v39   ;;  %v1846_v36 = vmul.f32 %v1844_v56, %v1837_v33  ;;  %v1712_v39 = vand.u32 127, %v3581_v38 }
 0x729   : > { %1685 = vperm.xlu0 %2429, %v2464_v43   ;;  %v3582_v43 = vld [vmem:[#allocation37_spill] sm:$0xff] }
 0x72a   : > { %vm1713_vm15 = vcmp.eq.s32.totalorder %v3582_v43, %v1712_v39 }
 0x72b   : > { %v2034_v33 = vsel %vm1713_vm15, 1.0, %v2586_v57 }
 0x72d   : > { %1854 = vperm.xlu0 %2429, %v1846_v36   ;;  %v1849_v36 = vstv %s1848_s29 }
 0x772   : > { %v1626_v51 = vpop.permute.xlu1 %1625 }
 0x773   : > { %v1616_v53 = vpop.permute.xlu0 %1615  ;;  %v1695_v13 = vmul.f32 %v1626_v51, %v1567_v21 }
 0x774   : > { %v1693_v24 = vmul.f32 %v1616_v53, %v1565_v58  ;;  %v1847_v58 = vld [vmem:[%s2729_s15] sm:$0xf] }
 0x776   : > { %v1631_v41 = vpop.permute.xlu1 %1630 }
 0x777   : > { %v1621_v48 = vpop.permute.xlu0 %1620  ;;  %v1696_v59 = vmul.f32 %v1631_v41, %v1568_v8 }
 0x778   : > { %v1694_v6 = vmul.f32 %v1621_v48, %v1566_v0 }
 0x779   : > { %v2228_v35 = vpack.c.bf16 %v1696_v59, %v1695_v13 }
 0x77a   : > { %v2224_v15 = vpack.c.bf16 %v1694_v6, %v1693_v24 }
 0x77c   : > { %2226 = vmatpush3.bf16.xpose.msk.msra.mxu0 %vm3406_vm14, %v2224_v15 }
 0x77d   : > { %2227 = vmatprep.subr.bf16.mxu0 %v2584_v16 }
 0x784   : > { %2230 = vmatpush3.bf16.xpose.msk.msra.mxu0 %vm3406_vm14, %v2228_v35 }
 0x785   : > { %2231 = vmatprep.subr.bf16.mxu0 %v2584_v16 }
 0x787   : > { %v1641_v19 = vpop.permute.xlu1 %1640 }
 0x788   : > { %v1636_v45 = vpop.permute.xlu0 %1635  ;;  %v1698_v5 = vmul.f32 %v1641_v19, %v1570_v3 }
 0x789   : > { %v1697_v40 = vmul.f32 %v1636_v45, %v1569_v63 }
 0x78b   : > { %v2232_v42 = vpack.c.bf16 %v1698_v5, %v1697_v40  ;;  %v1651_v50 = vpop.permute.xlu1 %1650 }
 0x78c   : > { %v1646_v20 = vpop.permute.xlu0 %1645  ;;  %v1700_v1 = vmul.f32 %v1651_v50, %v1572_v55 }
 0x78d   : > { %2234 = vmatpush3.bf16.xpose.msk.msra.mxu0 %vm3406_vm14, %v2232_v42  ;;  %v1699_v62 = vmul.f32 %v1646_v20, %v1571_v61 }
 0x78e   : > { %2235 = vmatprep.subr.bf16.mxu0 %v2584_v16 }
 0x78f   : > { %v2236_v10 = vpack.c.bf16 %v1700_v1, %v1699_v62 }
 0x793   : > { %v1661_v7 = vpop.permute.xlu1 %1660 }
 0x794   : > { %v1656_v11 = vpop.permute.xlu0 %1655  ;;  %v1702_v17 = vmul.f32 %v1661_v7, %v1574_v52 }
 0x795   : > { %2238 = vmatpush3.bf16.xpose.msk.msra.mxu0 %vm3406_vm14, %v2236_v10  ;;  %v1701_v32 = vmul.f32 %v1656_v11, %v1573_v46 }
 0x796   : > { %2239 = vmatprep.subr.bf16.mxu0 %v2584_v16 }
 0x797   : > { %v2240_v60 = vpack.c.bf16 %v1702_v17, %v1701_v32  ;;  %v1671_v30 = vpop.permute.xlu1 %1670 }
 0x798   : > { %v1666_v29 = vpop.permute.xlu0 %1665  ;;  %v1704_v25 = vmul.f32 %v1671_v30, %v1576_v2 }
 0x799   : > { %v1703_v22 = vmul.f32 %v1666_v29, %v1575_v4 }
 0x79b   : > { %v2244_v28 = vpack.c.bf16 %v1704_v25, %v1703_v22 }
 0x79d   : > { %2242 = vmatpush3.bf16.xpose.msk.msra.mxu0 %vm3406_vm14, %v2240_v60 }
 0x79e   : > { %2243 = vmatprep.subr.bf16.mxu0 %v2584_v16 }
 0x7a3   : > { %v1681_v47 = vpop.permute.xlu1 %1680 }
 0x7a4   : > { %v1676_v12 = vpop.permute.xlu0 %1675  ;;  %v1706_v9 = vmul.f32 %v1681_v47, %v1578_v23 }
 0x7a5   : > { %2246 = vmatpush3.bf16.xpose.msk.msra.mxu0 %vm3406_vm14, %v2244_v28  ;;  %v1705_v49 = vmul.f32 %v1676_v12, %v1577_v27 }
 0x7a6   : > { %2247 = vmatprep.subr.bf16.mxu0 %v2584_v16 }
 0x7a7   : > { %v2248_v26 = vpack.c.bf16 %v1706_v9, %v1705_v49  ;;  %v1691_v14 = vpop.permute.xlu1 %1690 }
 0x7a8   : > { %v1686_v37 = vpop.permute.xlu0 %1685  ;;  %v1708_v54 = vmul.f32 %v1691_v14, %v1580_v18 }
 0x7a9   : > { %v1707_v34 = vmul.f32 %v1686_v37, %v1579_v44 }
 0x7ab   : > { %v2252_v56 = vpack.c.bf16 %v1708_v54, %v1707_v34 }
 0x7ac   : > { %v1855_v48 = vpop.permute.xlu0 %1854 }
 0x7ad   : > { %2250 = vmatpush3.bf16.xpose.msk.msra.mxu0 %vm3406_vm14, %v2248_v26 }
 0x7ae   : > { %2251 = vmatprep.subr.bf16.mxu0 %v2584_v16 }
 0x7b5   : > { %2254 = vmatpush3.bf16.xpose.msk.msra.mxu0 %vm3406_vm14, %v2252_v56 }
 0x7bc   : > { %2221 = vmatmul.mubr.msk.f32.vlgmr.msra.gmra.mrb[0].mxu0 %vm785_vm8, %v2034_v33 }
 0x88f   : > { %v1833_v53 = vpop.f32.mrb[0].mxu0 }
 0x890   : > { %v1850_v16 = vmul.f32 %v1849_v36, %v1833_v53  ;;  %v2222_v0 = vpop.f32.mrb[1].mxu0 }
 0x892   : > { %v1851_v51 = vadd.f32 %v1850_v16, %v1847_v58 }
 0x894   : > { %v1857_v24 = vadd.f32 %v1855_v48, %v1851_v51 }
 0x896   : > { %1858 = vst [vmem:[%s324_s28] sm:$0xf] %v1857_v24 }
 0x897 PF: > { %s2053_s10 = sshll.u32 %s2559_s8, 1  ;;  %s1875_s14 = sshll.u32 %s324_s28, 4  ;;  %s3444_s14 = int_to_ptr.vmem [resolvable:$true] %s1875_s14 }
 0x898   : > { %s1871_s11 = sadd.s32 %s2555_s30, %s2053_s10  ;;  %s3583_s13 = sand.u32 1, %s2543_s27  }
 0x899   : > { %s2054_s16 = sshll.u32 %s1871_s11, 6  ;;  %s1860_s19 = scalar_lea.sflag [#allocation11], %s3583_s13 }
 0x89a   : > { %s1873_s12 = scalar_lea.hbm %s3508_s7, %s2054_s16  ;;  %s2465_s20 = scalar_lea.vmem %s3444_s14, 64 }
 0x89b   : > { %p2466_p4 = scmp.ne.s32.totalorder %s3444_s14, %s2465_s20  ;;  %s2587_s30 = smov [#allocation10]  }
 0x89c   : > { %s2469_s8 = sshll.u32 %s2587_s30, 4  ;;  %s2470_s8 = int_to_ptr.vmem [resolvable:$false] %s2469_s8 }
 0x89d   : > { %p2467_p5 = pnand %p2466_p4, %p2693_p6  ;;  %s2471_s28 = scalar_lea.vmem %s2470_s8, 128 }
 0x89e   : > { %p2472_p9 = scmp.lt.s32.totalorder %s3444_s14, %s2470_s8  ;;  %p2473_p10 = scmp.lt.s32.totalorder %s2471_s28, %s2465_s20 }
 0x89f   : > { %p2468_p8 = pneg %p2467_p5 }
 0x8a0   : > { %p2474_p11 = por %p2473_p10, %p2472_p9 }
 0x8a2   : > { %p2475_p12 = pnand %p2474_p11, %p2468_p8 }
 0x8a4   : > { %2478 = shalt.err (!%p2475_p12)
}
 0x8a5   : > { %s2479_s25 = scalar_lea.hbm %s1873_s12, 64  ;;  %s2483_s22 = scalar_lea.hbm %s3508_s7, 256 }
 0x8a6   : > { %p2480_p13 = scmp.ne.s32.totalorder %s1873_s12, %s2479_s25  ;;  %p2484_p2 = scmp.lt.u32.totalorder %s1873_s12, %s3508_s7 }
 0x8a7   : > { %p2485_p3 = scmp.lt.u32.totalorder %s2483_s22, %s2479_s25  ;;  %p2487_p5 = scmp.lt.u32.totalorder %s2479_s25, %s1873_s12 }
 0x8a8   : > { %p2481_p0 = pnand %p2480_p13, %p2693_p6 }
 0x8a9   : > { %p2486_p4 = por %p2485_p3, %p2484_p2 }
 0x8aa   : > { %p2482_p1 = pneg %p2481_p0 }
 0x8ab   : > { %p2488_p9 = por %p2487_p5, %p2486_p4 }
 0x8ad   : > { %p2489_p8 = pnand %p2488_p9, %p2482_p1 }
 0x8af   : > { %2492 = shalt.err (!%p2489_p8)
}
 0x8b0   : > { %2259 = dma.vmem_to_hbm [thread:$0]  (%p2693_p6), %s3444_s14, 64, %s1873_s12, %s1860_s19  }
 0x8b1 PF: > { %p2265_p10 = scmp.ge.s32.totalorder %s2575_s0, 2  ;;  %s1887_s10 = sand.u32 1, %s2539_s26  }
 0x8b2   : > { %s1888_s11 = scalar_lea.sflag [#allocation11], %s1887_s10 }
 0x8b3   : > { %p2262_p11 = pnand %p2265_p10, %p2700_p7 }
 0x8b5   : > { %2534 = dma.done.wait (!%p2262_p11), %s1888_s11, 64  }
 0x8b6   : > { %2536 = vsyncadd (!%p2262_p11), %s1888_s11, 4294967232  ;;  %s21_s0 = sadd.s32 1, %s2575_s0   ;;  %s3584_s16 = sld [smem:[#allocation13_spill]] }
 0x8b7   : > { %p18_p12 = scmp.ge.s32.totalorder %s21_s0, 10   ;;  %s3585_s28 = sld [smem:[#allocation20_spill]] }
 0x8b8   : > { %s3586_s29 = sld [smem:[#allocation14_spill]]  ;;  %s3587_s30 = sld [smem:[#allocation15_spill]] }
 0x8b9   : > { %s3588_s8 = sld [smem:[#allocation16_spill]]  ;;  %s3589_s9 = sld [smem:[#allocation17_spill]] }
 0x8ba   : > { %s3590_s10 = sld [smem:[#allocation18_spill]]  ;;  %s3591_s11 = sld [smem:[#allocation19_spill]] }
 0x8bb   : > { %s3592_s26 = smov %s2543_s27  ;;  %20 = sbr.rel (!%p18_p12) target bundleno = 8 (0x8), region = 94 }
 0x8bc   : > { %s3593_s27 = smov %s3584_s16 }
 0x8c2   :  { %1893 = vsyncpa [#allocation11], 1 }
 0x8c3   :  { %1895 = vsyncpa [#allocation11 + $0x1], 1 }

</bundles_post_ra>
